<compile_context>
chip_gen: v7x
topology: tpu7x:2x2x1
jax: 0.10.0
libtpu: 0.0.40
codegen_flags: <defaults>
</compile_context>

<pallas_src>
import functools

import jax
import jax.numpy as jnp
from jax.experimental import pallas as pl
from jax.experimental.pallas import tpu as pltpu


def _sefuse_kernel(rgb_ref, hha_ref, w1_ref, col_ref, row_ref, gbias_ref,
                   rgb_out_ref, hha_out_ref, *, inv_hw):
    """Fused SEfuse forward on one (B_TILE, C, HW_pad) batch slab.

    Packed weight layout (all f32):
      w1_ref : (2C, 2h)      cols [0:h]  = fsp_rgb FC1^T, [h:2h] = fsp_hha FC1^T
                              rows [0:C] act on the guide mean, [C:2C] on main
      col_ref: (C, 2h + 6)   [0:h] w2_rgb | [h:2h] w2_hha | b2_rgb | b2_hha |
                              wgl_rgb | wgl_hha | wgr_rgb | wgr_hha
      row_ref: (1, 2h)       [0:h] b1_rgb | [h:2h] b1_hha
      gbias  : (2,) SMEM     [bgl, bgr]
    """
    rgb = rgb_ref[...]                                   # (B, C, HWp)
    hha = hha_ref[...]                                   # (B, C, HWp)
    _, C, _ = rgb.shape
    f32 = jnp.float32
    hidden = w1_ref.shape[1] // 2

    # ---- AdaptiveAvgPool2d(1): mean over spatial lanes (padding is zeros) ---
    mean_rgb = jnp.sum(rgb.astype(f32), axis=2, keepdims=True) * inv_hw   # (B,C,1)
    mean_hha = jnp.sum(hha.astype(f32), axis=2, keepdims=True) * inv_hw   # (B,C,1)

    w1 = w1_ref[...]                                     # (2C, 2h)
    col = col_ref[...]                                   # (C, 2h+6)
    row = row_ref[...]                                   # (1, 2h)

    # ---- FilterLayer: sigmoid(W2 relu(W1 [guide; main] + b1) + b2) ----------
    # Tiny contractions -> VPU broadcast-mul + XLU reductions (no degenerate
    # MXU matvecs).
    def channel_weight(stream, guide_mean, main_mean):
        w1_s = w1[:, stream * hidden:(stream + 1) * hidden]          # (2C, h)
        b1_s = row[:, stream * hidden:(stream + 1) * hidden]         # (1, h)
        w2_s = col[:, stream * hidden:(stream + 1) * hidden]         # (C, h)
        b2_s = col[:, 2 * hidden + stream:2 * hidden + stream + 1]   # (C, 1)
        pre = (w1_s[:C, :][None] * guide_mean
               + w1_s[C:, :][None] * main_mean)                      # (B, C, h)
        h = jnp.maximum(jnp.sum(pre, axis=1, keepdims=True)
                        + b1_s[None], 0.0)                           # (B, 1, h)
        z = jnp.sum(w2_s[None] * h, axis=2, keepdims=True) + b2_s[None]  # (B,C,1)
        return jax.nn.sigmoid(z)                                     # (B, C, 1)

    cw_rgb = channel_weight(0, mean_hha, mean_rgb)   # FSP rgb: guide=hha, main=rgb
    cw_hha = channel_weight(1, mean_rgb, mean_hha)   # FSP hha: guide=rgb, main=hha

    # ---- FSP recalibration: main + channel_weight * guide -------------------
    rec_rgb = rgb + cw_rgb.astype(rgb.dtype) * hha                   # (B, C, HWp)
    rec_hha = hha + cw_hha.astype(hha.dtype) * rgb                   # (B, C, HWp)

    # ---- 1x1 gate convs over cat(rec_rgb, rec_hha): sublane reductions ------
    wgl_rgb = col[:, 2 * hidden + 2:2 * hidden + 3][None]            # (1, C, 1)
    wgl_hha = col[:, 2 * hidden + 3:2 * hidden + 4][None]
    wgr_rgb = col[:, 2 * hidden + 4:2 * hidden + 5][None]
    wgr_hha = col[:, 2 * hidden + 5:2 * hidden + 6][None]
    bgl = gbias_ref[0]
    bgr = gbias_ref[1]

    gate_l = jnp.sum(wgl_rgb * rec_rgb + wgl_hha * rec_hha,
                     axis=1, keepdims=True) + bgl                    # (B, 1, HWp)
    gate_r = jnp.sum(wgr_rgb * rec_rgb + wgr_hha * rec_hha,
                     axis=1, keepdims=True) + bgr                    # (B, 1, HWp)

    # ---- 2-way softmax == sigmoid of the difference; no a_r slab ------------
    a_l = jax.nn.sigmoid(gate_l - gate_r).astype(rgb.dtype)          # (B, 1, HWp)
    merge = hha + a_l * (rgb - hha)                                  # (B, C, HWp)

    rgb_out_ref[...] = (0.5 * jnp.maximum(rgb + merge, 0.0)).astype(rgb_out_ref.dtype)
    hha_out_ref[...] = (0.5 * jnp.maximum(hha + merge, 0.0)).astype(hha_out_ref.dtype)


def sefuse_forward(rgb_nchw, hha_nchw, params, *,
                   compute_dtype=jnp.float32, max_batch_tile=32):
    """PyTorch-equivalent SEfuse forward.  Inputs: (N, C, H, W).

    compute_dtype=jnp.bfloat16 halves HBM traffic / VALU slab ops on v6e/v7x;
    keep jnp.float32 on v5e (no bf16 VPU path) and for strict tolerances.
    """
    N, C, H, W = rgb_nchw.shape
    assert hha_nchw.shape == (N, C, H, W)
    HW = H * W

    w1_rgb, b1_rgb, w2_rgb, b2_rgb = params["fsp_rgb"]
    w1_hha, b1_hha, w2_hha, b2_hha = params["fsp_hha"]
    wgl, bgl = params["gate_rgb"]
    wgr, bgr = params["gate_hha"]
    hidden = w1_rgb.shape[0]

    # The (C,1) channel-weight broadcast against the guide map is only valid
    # when in_planes == out_planes (as in the module's use); assert it.
    assert w2_rgb.shape == (C, hidden) and w2_hha.shape == (C, hidden), \
        "SEfuse kernel requires FilterLayer out_planes == in_planes"
    assert w1_rgb.shape == (hidden, 2 * C) and w1_hha.shape == (hidden, 2 * C)

    # ---- lane-dense spatial layout, padded to a multiple of 128 -------------
    HW_pad = -(-HW // 128) * 128
    def prep(x):
        x = x.reshape(N, C, HW).astype(compute_dtype)
        if HW_pad != HW:
            x = jnp.pad(x, ((0, 0), (0, 0), (0, HW_pad - HW)))
        return x
    rgb = prep(rgb_nchw)
    hha = prep(hha_nchw)

    # ---- batch tiling: amortize per-grid-step overhead ----------------------
    itemsize = jnp.dtype(compute_dtype).itemsize
    # (2 inputs + 2 outputs) x double-buffer, per batch element:
    bytes_per_elem = 4 * 2 * C * HW_pad * itemsize
    vmem_budget = 24 * 1024 * 1024          # headroom vs. v7x 64 MiB physical
    b_tile = int(max(1, min(max_batch_tile, vmem_budget // bytes_per_elem, N)))
    if N >= 2:
        # keep >= 2 grid steps so both v7x TensorCores get work (no-op on 1-TC chips)
        b_tile = min(b_tile, -(-N // 2))
    n_steps = -(-N // b_tile)
    N_pad = n_steps * b_tile
    if N_pad != N:
        rgb = jnp.pad(rgb, ((0, N_pad - N), (0, 0), (0, 0)))
        hha = jnp.pad(hha, ((0, N_pad - N), (0, 0), (0, 0)))

    # ---- pack the 14 tiny weights into 3 VMEM operands + 1 SMEM pair --------
    f32 = jnp.float32
    w1_pack = jnp.concatenate(
        [w1_rgb.T.astype(f32), w1_hha.T.astype(f32)], axis=1)            # (2C, 2h)
    col_pack = jnp.concatenate(
        [w2_rgb.astype(f32), w2_hha.astype(f32),
         b2_rgb.reshape(C, 1).astype(f32), b2_hha.reshape(C, 1).astype(f32),
         wgl[0, :C, 0, 0].reshape(C, 1).astype(f32),   # gate_rgb on rec_rgb
         wgl[0, C:, 0, 0].reshape(C, 1).astype(f32),   # gate_rgb on rec_hha
         wgr[0, :C, 0, 0].reshape(C, 1).astype(f32),   # gate_hha on rec_rgb
         wgr[0, C:, 0, 0].reshape(C, 1).astype(f32)],  # gate_hha on rec_hha
        axis=1)                                                           # (C, 2h+6)
    row_pack = jnp.concatenate(
        [b1_rgb.reshape(1, hidden).astype(f32),
         b1_hha.reshape(1, hidden).astype(f32)], axis=1)                  # (1, 2h)
    gate_bias = jnp.concatenate(
        [bgl.reshape(1), bgr.reshape(1)]).astype(f32)                     # (2,) SMEM

    batch_spec = pl.BlockSpec((b_tile, C, HW_pad), lambda n: (n, 0, 0))
    kernel = functools.partial(_sefuse_kernel, inv_hw=1.0 / HW)

    rgb_out, hha_out = pl.pallas_call(
        kernel,
        out_shape=(jax.ShapeDtypeStruct((N_pad, C, HW_pad), compute_dtype),
                   jax.ShapeDtypeStruct((N_pad, C, HW_pad), compute_dtype)),
        grid_spec=pltpu.PrefetchScalarGridSpec(
            num_scalar_prefetch=0,
            grid=(n_steps,),
            in_specs=[batch_spec, batch_spec,
                      pl.BlockSpec(w1_pack.shape, lambda n: (0, 0)),
                      pl.BlockSpec(col_pack.shape, lambda n: (0, 0)),
                      pl.BlockSpec(row_pack.shape, lambda n: (0, 0)),
                      pl.BlockSpec(memory_space=pltpu.MemorySpace.SMEM)],
            out_specs=[batch_spec, batch_spec],
        ),
        compiler_params=pltpu.CompilerParams(
            dimension_semantics=("parallel",),
            vmem_limit_bytes=32 * 1024 * 1024),
    )(rgb, hha, w1_pack, col_pack, row_pack, gate_bias)

    rgb_out = rgb_out[:N, :, :HW].reshape(N, C, H, W)
    hha_out = hha_out[:N, :, :HW].reshape(N, C, H, W)
    return rgb_out, hha_out


def sefuse_reference(rgb, hha, params):
    """Pure-JAX reference matching torch SEfuse.forward semantics."""
    def filter_layer(x, w1, b1, w2, b2):
        y = jnp.mean(x, axis=(2, 3))                     # (N, 2C)
        y = jnp.maximum(y @ w1.T + b1, 0.0)              # (N, hidden)
        y = jax.nn.sigmoid(y @ w2.T + b2)                # (N, C)
        return y[:, :, None, None]                       # (N, C, 1, 1)

    def fsp(guide, main, p):
        w1, b1, w2, b2 = p
        combined = jnp.concatenate([guide, main], axis=1)
        cw = filter_layer(combined, w1, b1, w2, b2)
        return main + cw * guide

    rec_rgb = fsp(hha, rgb, params["fsp_rgb"])
    rec_hha = fsp(rgb, hha, params["fsp_hha"])
    cat_fea = jnp.concatenate([rec_rgb, rec_hha], axis=1)

    wgl, bgl = params["gate_rgb"]
    wgr, bgr = params["gate_hha"]
    l = jnp.einsum("nchw,c->nhw", cat_fea, wgl[0, :, 0, 0]) + bgl[0]
    r = jnp.einsum("nchw,c->nhw", cat_fea, wgr[0, :, 0, 0]) + bgr[0]
    att = jax.nn.softmax(jnp.stack([l, r], axis=1), axis=1)   # (N, 2, H, W)
    a_l, a_r = att[:, 0:1], att[:, 1:2]
    merge = rgb * a_l + hha * a_r
    rgb_out = jnp.maximum((rgb + merge) * 0.5, 0.0)
    hha_out = jnp.maximum((hha + merge) * 0.5, 0.0)
    return rgb_out, hha_out


if __name__ == "__main__":
    # in_planes == out_planes == 32, reduction=16 -> hidden = 2 (module default).
    # N=5, H=W=10 exercise both the batched (B_TILE>1) path, the batch padding
    # and the HW->128 lane padding (true-HW mean divisor).
    N, C, H, W = 5, 32, 10, 10
    reduction = 16
    hidden = C // reduction

    key = jax.random.PRNGKey(0)
    ks = jax.random.split(key, 14)

    rgb = jax.random.normal(ks[0], (N, C, H, W), dtype=jnp.float32)
    hha = jax.random.normal(ks[1], (N, C, H, W), dtype=jnp.float32)

    def lin(kw, kb, out_dim, in_dim):
        return (0.2 * jax.random.normal(kw, (out_dim, in_dim), jnp.float32),
                0.1 * jax.random.normal(kb, (out_dim,), jnp.float32))

    w1_rgb, b1_rgb = lin(ks[2], ks[3], hidden, 2 * C)   # Linear(2C -> hidden)
    w2_rgb, b2_rgb = lin(ks[4], ks[5], C, hidden)       # Linear(hidden -> C)
    w1_hha, b1_hha = lin(ks[6], ks[7], hidden, 2 * C)
    w2_hha, b2_hha = lin(ks[8], ks[9], C, hidden)

    # 1x1 gate convs: Conv2d(2C, 1, kernel_size=1, bias=True) -> OIHW weights.
    wgl = 0.2 * jax.random.normal(ks[10], (1, 2 * C, 1, 1), dtype=jnp.float32)
    bgl = 0.1 * jax.random.normal(ks[11], (1,), dtype=jnp.float32)
    wgr = 0.2 * jax.random.normal(ks[12], (1, 2 * C, 1, 1), dtype=jnp.float32)
    bgr = 0.1 * jax.random.normal(ks[13], (1,), dtype=jnp.float32)

    params = {
        "fsp_rgb": (w1_rgb, b1_rgb, w2_rgb, b2_rgb),
        "fsp_hha": (w1_hha, b1_hha, w2_hha, b2_hha),
        "gate_rgb": (wgl, bgl),
        "gate_hha": (wgr, bgr),
    }

    rgb_out, hha_out = sefuse_forward(rgb, hha, params)
    rgb_out = jax.block_until_ready(rgb_out)
    hha_out = jax.block_until_ready(hha_out)

    rgb_ref, hha_ref = sefuse_reference(rgb, hha, params)
    assert rgb_out.shape == (N, C, H, W) and hha_out.shape == (N, C, H, W)
    assert jnp.allclose(rgb_out, rgb_ref, rtol=1e-4, atol=1e-5), "rgb mismatch"
    assert jnp.allclose(hha_out, hha_ref, rtol=1e-4, atol=1e-5), "hha mismatch"

    print("KERNEL_OK")
</pallas_src>

<mosaic_0001>
module attributes {stable_mosaic.version = 11 : i64} {
  func.func @_sefuse_kernel(%arg0: i32, %arg1: memref<3x32x128xf32, #tpu.memory_space<vmem>>, %arg2: memref<3x32x128xf32, #tpu.memory_space<vmem>>, %arg3: memref<64x4xf32, #tpu.memory_space<vmem>>, %arg4: memref<32x10xf32, #tpu.memory_space<vmem>>, %arg5: memref<1x4xf32, #tpu.memory_space<vmem>>, %arg6: memref<2xf32, #tpu.memory_space<smem>>, %arg7: memref<3x32x128xf32, #tpu.memory_space<vmem>>, %arg8: memref<3x32x128xf32, #tpu.memory_space<vmem>>) attributes {dimension_semantics = [#tpu.dimension_semantics<parallel>], iteration_bounds = array<i64: 2>, scalar_prefetch = 0 : i64, scratch_operands = 0 : i64, tpu.core_type = #tpu.core_type<tc>, window_params = [{transform_indices = @transform_0, window_bounds = array<i64: 3, 32, 128>}, {transform_indices = @transform_1, window_bounds = array<i64: 3, 32, 128>}, {pipeline_mode = #tpu.pipeline_mode<synchronous>, transform_indices = @transform_2, window_bounds = array<i64: 64, 4>}, {pipeline_mode = #tpu.pipeline_mode<synchronous>, transform_indices = @transform_3, window_bounds = array<i64: 32, 10>}, {pipeline_mode = #tpu.pipeline_mode<synchronous>, transform_indices = @transform_4, window_bounds = array<i64: 1, 4>}, {transform_indices = @transform_5, window_bounds = array<i64: 2>}, {transform_indices = @transform_6, window_bounds = array<i64: 3, 32, 128>}, {transform_indices = @transform_7, window_bounds = array<i64: 3, 32, 128>}]} {
    %c0 = arith.constant 0 : index
    %c0_0 = arith.constant 0 : index
    %c0_1 = arith.constant 0 : index
    %0 = vector.load %arg1[%c0, %c0_0, %c0_1] : memref<3x32x128xf32, #tpu.memory_space<vmem>>, vector<3x32x128xf32>
    %c0_2 = arith.constant 0 : index
    %c0_3 = arith.constant 0 : index
    %c0_4 = arith.constant 0 : index
    %1 = vector.load %arg2[%c0_2, %c0_3, %c0_4] : memref<3x32x128xf32, #tpu.memory_space<vmem>>, vector<3x32x128xf32>
    %cst = arith.constant dense<0.000000e+00> : vector<3x32xf32>
    %2 = vector.multi_reduction <add>, %0, %cst [2] : vector<3x32x128xf32> to vector<3x32xf32>
    %3 = vector.shape_cast %2 : vector<3x32xf32> to vector<3x32x1xf32>
    %cst_5 = arith.constant 0.00999999977 : f32
    %4 = vector.broadcast %cst_5 : f32 to vector<3x32x1xf32>
    %5 = arith.mulf %3, %4 : vector<3x32x1xf32>
    %cst_6 = arith.constant dense<0.000000e+00> : vector<3x32xf32>
    %6 = vector.multi_reduction <add>, %1, %cst_6 [2] : vector<3x32x128xf32> to vector<3x32xf32>
    %7 = vector.shape_cast %6 : vector<3x32xf32> to vector<3x32x1xf32>
    %cst_7 = arith.constant 0.00999999977 : f32
    %8 = vector.broadcast %cst_7 : f32 to vector<3x32x1xf32>
    %9 = arith.mulf %7, %8 : vector<3x32x1xf32>
    %c0_8 = arith.constant 0 : index
    %c0_9 = arith.constant 0 : index
    %10 = vector.load %arg3[%c0_8, %c0_9] : memref<64x4xf32, #tpu.memory_space<vmem>>, vector<64x4xf32>
    %c0_10 = arith.constant 0 : index
    %c0_11 = arith.constant 0 : index
    %11 = vector.load %arg4[%c0_10, %c0_11] : memref<32x10xf32, #tpu.memory_space<vmem>>, vector<32x10xf32>
    %c0_12 = arith.constant 0 : index
    %c0_13 = arith.constant 0 : index
    %12 = vector.load %arg5[%c0_12, %c0_13] : memref<1x4xf32, #tpu.memory_space<vmem>>, vector<1x4xf32>
    %13 = vector.extract_strided_slice %10 {offsets = [0, 0], sizes = [64, 2], strides = [1, 1]} : vector<64x4xf32> to vector<64x2xf32>
    %14 = vector.extract_strided_slice %12 {offsets = [0, 0], sizes = [1, 2], strides = [1, 1]} : vector<1x4xf32> to vector<1x2xf32>
    %15 = vector.extract_strided_slice %11 {offsets = [0, 0], sizes = [32, 2], strides = [1, 1]} : vector<32x10xf32> to vector<32x2xf32>
    %16 = vector.extract_strided_slice %11 {offsets = [0, 4], sizes = [32, 1], strides = [1, 1]} : vector<32x10xf32> to vector<32x1xf32>
    %17 = vector.extract_strided_slice %13 {offsets = [0, 0], sizes = [32, 2], strides = [1, 1]} : vector<64x2xf32> to vector<32x2xf32>
    %18 = vector.shape_cast %17 : vector<32x2xf32> to vector<1x32x2xf32>
    %19 = vector.broadcast %18 : vector<1x32x2xf32> to vector<3x32x2xf32>
    %20 = vector.broadcast %9 : vector<3x32x1xf32> to vector<3x32x2xf32>
    %21 = arith.mulf %19, %20 : vector<3x32x2xf32>
    %22 = vector.extract_strided_slice %13 {offsets = [32, 0], sizes = [32, 2], strides = [1, 1]} : vector<64x2xf32> to vector<32x2xf32>
    %23 = vector.shape_cast %22 : vector<32x2xf32> to vector<1x32x2xf32>
    %24 = vector.broadcast %23 : vector<1x32x2xf32> to vector<3x32x2xf32>
    %25 = vector.broadcast %5 : vector<3x32x1xf32> to vector<3x32x2xf32>
    %26 = arith.mulf %24, %25 : vector<3x32x2xf32>
    %27 = arith.addf %21, %26 : vector<3x32x2xf32>
    %cst_14 = arith.constant dense<0.000000e+00> : vector<3x2xf32>
    %28 = vector.multi_reduction <add>, %27, %cst_14 [1] : vector<3x32x2xf32> to vector<3x2xf32>
    %29 = vector.shape_cast %28 : vector<3x2xf32> to vector<3x1x2xf32>
    %30 = vector.shape_cast %14 : vector<1x2xf32> to vector<1x1x2xf32>
    %31 = vector.broadcast %30 : vector<1x1x2xf32> to vector<3x1x2xf32>
    %32 = arith.addf %29, %31 : vector<3x1x2xf32>
    %cst_15 = arith.constant 0.000000e+00 : f32
    %33 = vector.broadcast %cst_15 : f32 to vector<3x1x2xf32>
    %34 = arith.maximumf %32, %33 : vector<3x1x2xf32>
    %35 = vector.shape_cast %15 : vector<32x2xf32> to vector<1x32x2xf32>
    %36 = vector.broadcast %35 : vector<1x32x2xf32> to vector<3x32x2xf32>
    %37 = vector.broadcast %34 : vector<3x1x2xf32> to vector<3x32x2xf32>
    %38 = arith.mulf %36, %37 : vector<3x32x2xf32>
    %cst_16 = arith.constant dense<0.000000e+00> : vector<3x32xf32>
    %39 = vector.multi_reduction <add>, %38, %cst_16 [2] : vector<3x32x2xf32> to vector<3x32xf32>
    %40 = vector.shape_cast %39 : vector<3x32xf32> to vector<3x32x1xf32>
    %41 = vector.shape_cast %16 : vector<32x1xf32> to vector<1x32x1xf32>
    %42 = vector.broadcast %41 : vector<1x32x1xf32> to vector<3x32x1xf32>
    %43 = arith.addf %40, %42 : vector<3x32x1xf32>
    %44 = arith.negf %43 : vector<3x32x1xf32>
    %45 = math.exp %44 : vector<3x32x1xf32>
    %cst_17 = arith.constant 1.000000e+00 : f32
    %46 = vector.broadcast %cst_17 : f32 to vector<3x32x1xf32>
    %47 = arith.addf %46, %45 : vector<3x32x1xf32>
    %48 = arith.divf %46, %47 : vector<3x32x1xf32>
    %49 = vector.extract_strided_slice %10 {offsets = [0, 2], sizes = [64, 2], strides = [1, 1]} : vector<64x4xf32> to vector<64x2xf32>
    %50 = vector.extract_strided_slice %12 {offsets = [0, 2], sizes = [1, 2], strides = [1, 1]} : vector<1x4xf32> to vector<1x2xf32>
    %51 = vector.extract_strided_slice %11 {offsets = [0, 2], sizes = [32, 2], strides = [1, 1]} : vector<32x10xf32> to vector<32x2xf32>
    %52 = vector.extract_strided_slice %11 {offsets = [0, 5], sizes = [32, 1], strides = [1, 1]} : vector<32x10xf32> to vector<32x1xf32>
    %53 = vector.extract_strided_slice %49 {offsets = [0, 0], sizes = [32, 2], strides = [1, 1]} : vector<64x2xf32> to vector<32x2xf32>
    %54 = vector.shape_cast %53 : vector<32x2xf32> to vector<1x32x2xf32>
    %55 = vector.broadcast %54 : vector<1x32x2xf32> to vector<3x32x2xf32>
    %56 = vector.broadcast %5 : vector<3x32x1xf32> to vector<3x32x2xf32>
    %57 = arith.mulf %55, %56 : vector<3x32x2xf32>
    %58 = vector.extract_strided_slice %49 {offsets = [32, 0], sizes = [32, 2], strides = [1, 1]} : vector<64x2xf32> to vector<32x2xf32>
    %59 = vector.shape_cast %58 : vector<32x2xf32> to vector<1x32x2xf32>
    %60 = vector.broadcast %59 : vector<1x32x2xf32> to vector<3x32x2xf32>
    %61 = vector.broadcast %9 : vector<3x32x1xf32> to vector<3x32x2xf32>
    %62 = arith.mulf %60, %61 : vector<3x32x2xf32>
    %63 = arith.addf %57, %62 : vector<3x32x2xf32>
    %cst_18 = arith.constant dense<0.000000e+00> : vector<3x2xf32>
    %64 = vector.multi_reduction <add>, %63, %cst_18 [1] : vector<3x32x2xf32> to vector<3x2xf32>
    %65 = vector.shape_cast %64 : vector<3x2xf32> to vector<3x1x2xf32>
    %66 = vector.shape_cast %50 : vector<1x2xf32> to vector<1x1x2xf32>
    %67 = vector.broadcast %66 : vector<1x1x2xf32> to vector<3x1x2xf32>
    %68 = arith.addf %65, %67 : vector<3x1x2xf32>
    %cst_19 = arith.constant 0.000000e+00 : f32
    %69 = vector.broadcast %cst_19 : f32 to vector<3x1x2xf32>
    %70 = arith.maximumf %68, %69 : vector<3x1x2xf32>
    %71 = vector.shape_cast %51 : vector<32x2xf32> to vector<1x32x2xf32>
    %72 = vector.broadcast %71 : vector<1x32x2xf32> to vector<3x32x2xf32>
    %73 = vector.broadcast %70 : vector<3x1x2xf32> to vector<3x32x2xf32>
    %74 = arith.mulf %72, %73 : vector<3x32x2xf32>
    %cst_20 = arith.constant dense<0.000000e+00> : vector<3x32xf32>
    %75 = vector.multi_reduction <add>, %74, %cst_20 [2] : vector<3x32x2xf32> to vector<3x32xf32>
    %76 = vector.shape_cast %75 : vector<3x32xf32> to vector<3x32x1xf32>
    %77 = vector.shape_cast %52 : vector<32x1xf32> to vector<1x32x1xf32>
    %78 = vector.broadcast %77 : vector<1x32x1xf32> to vector<3x32x1xf32>
    %79 = arith.addf %76, %78 : vector<3x32x1xf32>
    %80 = arith.negf %79 : vector<3x32x1xf32>
    %81 = math.exp %80 : vector<3x32x1xf32>
    %cst_21 = arith.constant 1.000000e+00 : f32
    %82 = vector.broadcast %cst_21 : f32 to vector<3x32x1xf32>
    %83 = arith.addf %82, %81 : vector<3x32x1xf32>
    %84 = arith.divf %82, %83 : vector<3x32x1xf32>
    %85 = vector.broadcast %48 : vector<3x32x1xf32> to vector<3x32x128xf32>
    %86 = arith.mulf %85, %1 : vector<3x32x128xf32>
    %87 = arith.addf %0, %86 : vector<3x32x128xf32>
    %88 = vector.broadcast %84 : vector<3x32x1xf32> to vector<3x32x128xf32>
    %89 = arith.mulf %88, %0 : vector<3x32x128xf32>
    %90 = arith.addf %1, %89 : vector<3x32x128xf32>
    %91 = vector.extract_strided_slice %11 {offsets = [0, 6], sizes = [32, 1], strides = [1, 1]} : vector<32x10xf32> to vector<32x1xf32>
    %92 = vector.shape_cast %91 : vector<32x1xf32> to vector<1x32x1xf32>
    %93 = vector.extract_strided_slice %11 {offsets = [0, 7], sizes = [32, 1], strides = [1, 1]} : vector<32x10xf32> to vector<32x1xf32>
    %94 = vector.shape_cast %93 : vector<32x1xf32> to vector<1x32x1xf32>
    %95 = vector.extract_strided_slice %11 {offsets = [0, 8], sizes = [32, 1], strides = [1, 1]} : vector<32x10xf32> to vector<32x1xf32>
    %96 = vector.shape_cast %95 : vector<32x1xf32> to vector<1x32x1xf32>
    %97 = vector.extract_strided_slice %11 {offsets = [0, 9], sizes = [32, 1], strides = [1, 1]} : vector<32x10xf32> to vector<32x1xf32>
    %98 = vector.shape_cast %97 : vector<32x1xf32> to vector<1x32x1xf32>
    %c0_22 = arith.constant 0 : index
    %99 = memref.load %arg6[%c0_22] : memref<2xf32, #tpu.memory_space<smem>>
    %c1 = arith.constant 1 : index
    %100 = memref.load %arg6[%c1] : memref<2xf32, #tpu.memory_space<smem>>
    %101 = vector.broadcast %92 : vector<1x32x1xf32> to vector<3x32x128xf32>
    %102 = arith.mulf %101, %87 : vector<3x32x128xf32>
    %103 = vector.broadcast %94 : vector<1x32x1xf32> to vector<3x32x128xf32>
    %104 = arith.mulf %103, %90 : vector<3x32x128xf32>
    %105 = arith.addf %102, %104 : vector<3x32x128xf32>
    %cst_23 = arith.constant dense<0.000000e+00> : vector<3x128xf32>
    %106 = vector.multi_reduction <add>, %105, %cst_23 [1] : vector<3x32x128xf32> to vector<3x128xf32>
    %107 = vector.shape_cast %106 : vector<3x128xf32> to vector<3x1x128xf32>
    %108 = vector.broadcast %99 : f32 to vector<3x1x128xf32>
    %109 = arith.addf %107, %108 : vector<3x1x128xf32>
    %110 = vector.broadcast %96 : vector<1x32x1xf32> to vector<3x32x128xf32>
    %111 = arith.mulf %110, %87 : vector<3x32x128xf32>
    %112 = vector.broadcast %98 : vector<1x32x1xf32> to vector<3x32x128xf32>
    %113 = arith.mulf %112, %90 : vector<3x32x128xf32>
    %114 = arith.addf %111, %113 : vector<3x32x128xf32>
    %cst_24 = arith.constant dense<0.000000e+00> : vector<3x128xf32>
    %115 = vector.multi_reduction <add>, %114, %cst_24 [1] : vector<3x32x128xf32> to vector<3x128xf32>
    %116 = vector.shape_cast %115 : vector<3x128xf32> to vector<3x1x128xf32>
    %117 = vector.broadcast %100 : f32 to vector<3x1x128xf32>
    %118 = arith.addf %116, %117 : vector<3x1x128xf32>
    %119 = arith.subf %109, %118 : vector<3x1x128xf32>
    %120 = arith.negf %119 : vector<3x1x128xf32>
    %121 = math.exp %120 : vector<3x1x128xf32>
    %cst_25 = arith.constant 1.000000e+00 : f32
    %122 = vector.broadcast %cst_25 : f32 to vector<3x1x128xf32>
    %123 = arith.addf %122, %121 : vector<3x1x128xf32>
    %124 = arith.divf %122, %123 : vector<3x1x128xf32>
    %125 = arith.subf %0, %1 : vector<3x32x128xf32>
    %126 = vector.broadcast %124 : vector<3x1x128xf32> to vector<3x32x128xf32>
    %127 = arith.mulf %126, %125 : vector<3x32x128xf32>
    %128 = arith.addf %1, %127 : vector<3x32x128xf32>
    %129 = arith.addf %0, %128 : vector<3x32x128xf32>
    %cst_26 = arith.constant 0.000000e+00 : f32
    %130 = vector.broadcast %cst_26 : f32 to vector<3x32x128xf32>
    %131 = arith.maximumf %129, %130 : vector<3x32x128xf32>
    %cst_27 = arith.constant 5.000000e-01 : f32
    %132 = vector.broadcast %cst_27 : f32 to vector<3x32x128xf32>
    %133 = arith.mulf %132, %131 : vector<3x32x128xf32>
    %c0_28 = arith.constant 0 : index
    %c0_29 = arith.constant 0 : index
    %c0_30 = arith.constant 0 : index
    %134 = vector.load %arg7[%c0_28, %c0_29, %c0_30] : memref<3x32x128xf32, #tpu.memory_space<vmem>>, vector<3x32x128xf32>
    tpu.vector_store %arg7[%c0_28, %c0_29, %c0_30], %133 {strides = array<i32>} : memref<3x32x128xf32, #tpu.memory_space<vmem>>, vector<3x32x128xf32>,
    %135 = arith.addf %1, %128 : vector<3x32x128xf32>
    %cst_31 = arith.constant 0.000000e+00 : f32
    %136 = vector.broadcast %cst_31 : f32 to vector<3x32x128xf32>
    %137 = arith.maximumf %135, %136 : vector<3x32x128xf32>
    %cst_32 = arith.constant 5.000000e-01 : f32
    %138 = vector.broadcast %cst_32 : f32 to vector<3x32x128xf32>
    %139 = arith.mulf %138, %137 : vector<3x32x128xf32>
    %c0_33 = arith.constant 0 : index
    %c0_34 = arith.constant 0 : index
    %c0_35 = arith.constant 0 : index
    %140 = vector.load %arg8[%c0_33, %c0_34, %c0_35] : memref<3x32x128xf32, #tpu.memory_space<vmem>>, vector<3x32x128xf32>
    tpu.vector_store %arg8[%c0_33, %c0_34, %c0_35], %139 {strides = array<i32>} : memref<3x32x128xf32, #tpu.memory_space<vmem>>, vector<3x32x128xf32>,
    return
  }
  func.func @transform_0(%arg0: i32) -> (i32, i32, i32) {
    %c0_i32 = arith.constant 0 : i32
    %c0_i32_0 = arith.constant 0 : i32
    %c0_i32_1 = arith.constant 0 : i32
    return %arg0, %c0_i32, %c0_i32_0 : i32, i32, i32
  }
  func.func @transform_1(%arg0: i32) -> (i32, i32, i32) {
    %c0_i32 = arith.constant 0 : i32
    %c0_i32_0 = arith.constant 0 : i32
    %c0_i32_1 = arith.constant 0 : i32
    return %arg0, %c0_i32, %c0_i32_0 : i32, i32, i32
  }
  func.func @transform_2(%arg0: i32) -> (i32, i32) {
    %c0_i32 = arith.constant 0 : i32
    %c0_i32_0 = arith.constant 0 : i32
    %c0_i32_1 = arith.constant 0 : i32
    return %c0_i32, %c0_i32_0 : i32, i32
  }
  func.func @transform_3(%arg0: i32) -> (i32, i32) {
    %c0_i32 = arith.constant 0 : i32
    %c0_i32_0 = arith.constant 0 : i32
    %c0_i32_1 = arith.constant 0 : i32
    return %c0_i32, %c0_i32_0 : i32, i32
  }
  func.func @transform_4(%arg0: i32) -> (i32, i32) {
    %c0_i32 = arith.constant 0 : i32
    %c0_i32_0 = arith.constant 0 : i32
    %c0_i32_1 = arith.constant 0 : i32
    return %c0_i32, %c0_i32_0 : i32, i32
  }
  func.func @transform_5(%arg0: i32) -> i32 {
    %c0_i32 = arith.constant 0 : i32
    %c0_i32_0 = arith.constant 0 : i32
    return %c0_i32 : i32
  }
  func.func @transform_6(%arg0: i32) -> (i32, i32, i32) {
    %c0_i32 = arith.constant 0 : i32
    %c0_i32_0 = arith.constant 0 : i32
    %c0_i32_1 = arith.constant 0 : i32
    return %arg0, %c0_i32, %c0_i32_0 : i32, i32, i32
  }
  func.func @transform_7(%arg0: i32) -> (i32, i32, i32) {
    %c0_i32 = arith.constant 0 : i32
    %c0_i32_0 = arith.constant 0 : i32
    %c0_i32_1 = arith.constant 0 : i32
    return %arg0, %c0_i32, %c0_i32_0 : i32, i32, i32
  }
}

</mosaic_0001>

<bundles_post_ra>
// kernel: tpu_custom_call.1
= control target key start
LH: loop header
LB: loop body
LE: loop exit
PB: predicated region body
PF: predicated region fallthrough
CT: control target
= control target key end

     0   :  { %s3271_s0 = inlined_call_operand.hbm [shape: f32[6,32,128], index: 0, kind: input, shape index: {}]   ;;  %s3272_s1 = inlined_call_operand.hbm [shape: f32[6,32,128], index: 1, kind: input, shape index: {}]   ;;  %s3273_s2 = inlined_call_operand.vmem [shape: f32[64,4], index: 2, kind: input, shape index: {}]   ;;  %s3274_s3 = inlined_call_operand.vmem [shape: f32[32,10], index: 3, kind: input, shape index: {}]   ;;  %s3275_s4 = inlined_call_operand.vmem [shape: f32[1,4], index: 4, kind: input, shape index: {}]   ;;  %s3276_s5 = inlined_call_operand.vmem [shape: f32[2], index: 5, kind: input, shape index: {}]   ;;  %s3277_s6 = inlined_call_operand.hbm [shape: f32[6,32,128], index: 6, kind: output, shape index: {0}]   ;;  %s3278_s7 = inlined_call_operand.hbm [shape: f32[6,32,128], index: 7, kind: output, shape index: {1}]  }
   0x1   :  { %3322 = sst [smem:[#allocation41_spill]] %s3271_s0 }
   0x2   :  { %3323 = sst [smem:[#allocation42_spill]] %s3276_s5 }
   0x3   :  { %13 = vsyncpa [#allocation3], 0 }
   0x4   :  { %15 = vsyncpa [#allocation3 + $0x1], 0 }
   0x5   :  { %16 = vsyncpa [#allocation7], 0 }
   0x6   :  { %18 = vsyncpa [#allocation7 + $0x1], 0 }
   0x7   :  { %19 = vsyncpa [#allocation5], 0 }
   0x8   :  { %20 = vsyncpa [#allocation4], 0 }
   0x9   :  { %22 = vsyncpa [#allocation4 + $0x1], 0 }
   0xa   :  { %23 = vsyncpa [#allocation11], 0 }
   0xb   :  { %25 = vsyncpa [#allocation11 + $0x1], 0  ;;  %s2206_s24 = smov 0   ;;  %s2208_s25 = smov 0  }
   0xc   :  { %s2210_s26 = smov 0   ;;  %s2212_s27 = smov 0  }
   0xd LB: > { %3324 = sst [smem:[#allocation17_spill]] %s2144_s26  ;;  %s2227_s28 = sadd.s32 4294967295, %s2148_s27   ;;  %s2148_s27 = sphi %s2212_s27, %s3391_s27   ;;  %s2144_s26 = sphi %s2210_s26, %s3390_s26   ;;  %s2140_s25 = sphi %s2208_s25, %s3389_s25   ;;  %s2136_s24 = sphi %s2206_s24, %s3388_s24  }
   0xe   : > { %s1679_s29 = sadd.s32 4294967294, %s2148_s27   ;;  %s2231_s30 = sadd.s32 1, %s2148_s27  }
   0xf   : > { %s38_s8 = sadd.s32 1, %s2144_s26  ;;  %s35_s9 = ssub.s32 %s2148_s27, %s2231_s30 }
  0x10   : > { %p45_p0 = scmp.ne.s32.totalorder %s2144_s26, %s2140_s25  ;;  %p36_p1 = scmp.eq.s32.totalorder %s35_s9, 0 }
  0x11   : > { %p46_p2 = scmp.eq.s32.totalorder %s2148_s27, 0  ;;  %p51_p3 = scmp.ne.s32.totalorder %s2140_s25, %s2136_s24 }
  0x12   : > { %p3279_p4 = scmp.eq.s32.totalorder %s2227_s28, 0  ;;  %p185_p7 = scmp.eq.s32.totalorder %s2227_s28, 1 }
  0x13   : > { %s2243_s10 = scalar_select %p36_p1, %s2144_s26, %s38_s8  }
  0x14   : > { %p2245_p5 = por %p46_p2, %p45_p0  ;;  %p2251_p6 = por %p3279_p4, %p51_p3 }
  0x15   : > { %3325 = sst [smem:[#allocation18_spill]] %s2243_s10  ;;  %p191_p8 = scmp.eq.s32.totalorder %s1679_s29, 1 }
  0x16   : > { %s3327_s12 = scalar_select %p2251_p6, 1, 0 }
  0x17   : > { %p1680_p9 = scmp.ge.s32.totalorder %s2148_s27, 1  ;;  %p224_p10 = scmp.lt.s32.totalorder %s2148_s27, 3 }
  0x18   : > { %p2258_p11 = por %p185_p7, %p45_p0  ;;  %p2262_p12 = por %p191_p8, %p51_p3 }
  0x19   : > { %p2266_p13 = pnand %p1680_p9, %p224_p10  ;;  %s3331_s5 = sld [smem:[#allocation42_spill]] }
  0x1a   : > { %s3328_s13 = scalar_select %p2258_p11, 1, 0 }
  0x1b   : > { %s3329_s14 = scalar_select %p2262_p12, 1, 0 }
  0x1c   : > { %p1750_p1 = pneg %p2266_p13  ;;  %p1769_p2 = scmp.lt.s32.totalorder %s2148_s27, 2 }
  0x1d   : > { %s2284_s20 = sand.u32 1, %s2144_s26  }
  0x1e   : > { %p2279_p7 = pnand %p1750_p1, %p3279_p4  ;;  %p2288_p3 = pnand %p1769_p2, %p2245_p5 }
  0x1f   : > { %s246_s18 = sshll.u32 %s3331_s5, 4  ;;  %s3281_s22 = smul.u32 96, %s2284_s20  ;;  %s247_s18 = int_to_ptr.vmem [resolvable:$true] %s246_s18 }
  0x20   : > { %s1967_s23 = scalar_lea.vmem %s247_s18, 16  ;;  %p1969_p9 = pneg %p2279_p7 }
  0x21   : > { %p1968_p8 = scmp.ne.s32.totalorder %s247_s18, %s1967_s23  ;;  %p1975_p1 = scmp.lt.s32.totalorder %s247_s18, %s247_s18 }
  0x22   : > { %p1976_p4 = scmp.lt.s32.totalorder %s1967_s23, %s1967_s23 }
  0x23   : > { %p1970_p10 = pnand %p1969_p9, %p1968_p8 }
  0x24   : > { %p1977_p12 = por %p1976_p4, %p1975_p1 }
  0x25   : > { %p1971_p0 = pneg %p1970_p10 }
  0x27   : > { %p1978_p11 = pnand %p1977_p12, %p1971_p0 }
  0x29   : > { %1981 = shalt.err (!%p1978_p11)
}
  0x2a   : > { %s2150_s29 = smov [#allocation8]   ;;  %s1731_s8 = smul.u32 1536, %s2148_s27 }
  0x2b   : > { %1753 = dma.vmem_to_smem (!%p2279_p7), %s247_s18, 16, %s2150_s29, [#allocation5]  }
  0x2c   : > { %s261_s9 = scalar_lea.vmem [#allocation2], %s3281_s22  ;;  %s3334_s0 = sld [smem:[#allocation41_spill]] }
  0x2d   : > { %s269_s11 = sshll.u32 %s261_s9, 4  ;;  %s258_s19 = scalar_lea.sflag [#allocation3], %s2284_s20  ;;  %s2300_s11 = int_to_ptr.vmem [resolvable:$true] %s269_s11 }
  0x2e   : > { %p1984_p5 = pneg %p2288_p3 }
  0x32   : > { %s2307_s23 = scalar_lea.hbm %s3334_s0, %s1731_s8  ;;  %s1987_s9 = scalar_lea.hbm %s3334_s0, 3072 }
  0x33   : > { %s1982_s5 = scalar_lea.hbm %s2307_s23, 1536  ;;  %p1988_p0 = scmp.lt.u32.totalorder %s2307_s23, %s3334_s0 }
  0x34   : > { %p1983_p4 = scmp.ne.s32.totalorder %s2307_s23, %s1982_s5  ;;  %p1989_p2 = scmp.lt.u32.totalorder %s1987_s9, %s1982_s5 }
  0x35   : > { %p1991_p8 = scmp.lt.u32.totalorder %s1982_s5, %s2307_s23 }
  0x36   : > { %p1985_p11 = pnand %p1984_p5, %p1983_p4  ;;  %p1990_p7 = por %p1989_p2, %p1988_p0 }
  0x38   : > { %p1986_p12 = pneg %p1985_p11  ;;  %p1992_p9 = por %p1991_p8, %p1990_p7 }
  0x3a   : > { %p1993_p10 = pnand %p1992_p9, %p1986_p12 }
  0x3c   : > { %1996 = shalt.err (!%p1993_p10)
}
  0x3d   : > { %s1997_s22 = scalar_lea.vmem %s2300_s11, 1536  ;;  %s2151_s18 = smov [#allocation2]  }
  0x3e   : > { %p1998_p1 = scmp.ne.s32.totalorder %s2300_s11, %s1997_s22  ;;  %s2002_s29 = sshll.u32 %s2151_s18, 4  ;;  %s2003_s29 = int_to_ptr.vmem [resolvable:$false] %s2002_s29 }
  0x3f   : > { %s2004_s16 = scalar_lea.vmem %s2003_s29, 3072  ;;  %p2005_p6 = scmp.lt.s32.totalorder %s2300_s11, %s2003_s29 }
  0x40   : > { %p2000_p4 = pnand %p1998_p1, %p1984_p5  ;;  %p2006_p0 = scmp.lt.s32.totalorder %s2004_s16, %s1997_s22 }
  0x42   : > { %p2001_p11 = pneg %p2000_p4  ;;  %p2007_p2 = por %p2006_p0, %p2005_p6 }
  0x44   : > { %p2008_p7 = pnand %p2007_p2, %p2001_p11 }
  0x46   : > { %2011 = shalt.err (!%p2008_p7)
}
  0x47   : > { %s2152_s5 = smov 128   ;;  %s2153_s9 = smov 8  }
  0x48   : > { %1757 = dma.hbm_to_vmem [thread:$0]  (!%p2288_p3), %s2307_s23, 1536, %s2300_s11, %s258_s19, %s2152_s5, %s2152_s5, %s2153_s9  }
  0x49   : > { %s2345_s18 = scalar_lea.hbm %s3272_s1, %s1731_s8  ;;  %s3335_s29 = smul.u32 96, %s2284_s20 }
  0x4a   : > { %s280_s10 = scalar_lea.sflag [#allocation7], %s2284_s20  ;;  %s2012_s26 = scalar_lea.hbm %s2345_s18, 1536 }
  0x4b   : > { %s283_s16 = scalar_lea.vmem [#allocation6], %s3335_s29  ;;  %p2013_p6 = scmp.ne.s32.totalorder %s2345_s18, %s2012_s26 }
  0x4c   : > { %s291_s0 = sshll.u32 %s283_s16, 4  ;;  %s2017_s8 = scalar_lea.hbm %s3272_s1, 3072  ;;  %s2349_s0 = int_to_ptr.vmem [resolvable:$true] %s291_s0 }
  0x4d   : > { %p2015_p12 = pnand %p2013_p6, %p1984_p5  ;;  %p2018_p9 = scmp.lt.u32.totalorder %s2345_s18, %s3272_s1 }
  0x4e   : > { %p2019_p10 = scmp.lt.u32.totalorder %s2017_s8, %s2012_s26  ;;  %p2021_p4 = scmp.lt.u32.totalorder %s2012_s26, %s2345_s18 }
  0x4f   : > { %p2016_p8 = pneg %p2015_p12 }
  0x50   : > { %p2020_p1 = por %p2019_p10, %p2018_p9 }
  0x52   : > { %p2022_p11 = por %p2021_p4, %p2020_p1 }
  0x54   : > { %p2023_p0 = pnand %p2022_p11, %p2016_p8 }
  0x56   : > { %2026 = shalt.err (!%p2023_p0)
}
  0x57   : > { %s2027_s17 = scalar_lea.vmem %s2349_s0, 1536  ;;  %s2154_s29 = smov [#allocation6]  }
  0x58   : > { %p2028_p2 = scmp.ne.s32.totalorder %s2349_s0, %s2027_s17  ;;  %s2032_s16 = sshll.u32 %s2154_s29, 4  ;;  %s2033_s16 = int_to_ptr.vmem [resolvable:$false] %s2032_s16 }
  0x59   : > { %s2034_s11 = scalar_lea.vmem %s2033_s16, 3072  ;;  %p2035_p12 = scmp.lt.s32.totalorder %s2349_s0, %s2033_s16 }
  0x5a   : > { %p2030_p7 = pnand %p2028_p2, %p1984_p5  ;;  %p2036_p9 = scmp.lt.s32.totalorder %s2034_s11, %s2027_s17 }
  0x5c   : > { %p2031_p6 = pneg %p2030_p7  ;;  %p2037_p10 = por %p2036_p9, %p2035_p12 }
  0x5e   : > { %p2038_p1 = pnand %p2037_p10, %p2031_p6 }
  0x60   : > { %2041 = shalt.err (!%p2038_p1)
}
  0x61   : > { %1760 = dma.hbm_to_vmem [thread:$0]  (!%p2288_p3), %s2345_s18, 1536, %s2349_s0, %s280_s10, %s2152_s5, %s2152_s5, %s2153_s9  }
  0x62   : > { %303 = sbr.rel (%p2266_p13) target bundleno = 971 (0x3cb), region = 44 }
  0x69   : > { %s2383_s26 = sand.u32 1, %s2140_s25   ;;  %p3336_p5 = scmp.ne.s32.totalorder %s3327_s12, 0 }
  0x6a   : > { %s2386_s23 = smul.u32 96, %s2383_s26  ;;  %s306_s21 = scalar_lea.sflag [#allocation3], %s2383_s26 }
  0x6c   : > { %s2390_s8 = scalar_lea.vmem [#allocation2], %s2386_s23 }
  0x6d   : > { %2115 = dma.done.wait (%p3336_p5), %s306_s21, 1536  }
  0x6e   : > { %2117 = vsyncadd (%p3336_p5), %s306_s21, 4294965760  ;;  %s315_s0 = scalar_lea.sflag [#allocation7], %s2383_s26  ;;  %s2398_s10 = scalar_lea.vmem [#allocation6], %s2386_s23 }
  0x6f   : > { %2119 = dma.done.wait (%p3336_p5), %s315_s0, 1536  }
  0x70   : > { %2121 = vsyncadd (%p3336_p5), %s315_s0, 4294965760  ;;  %p3337_p13 = scmp.eq.s32.totalorder %s2227_s28, 0 }
  0x72   : > { %2123 = dma.done.wait (%p3337_p13), [#allocation5], 16   ;;  %p3338_p3 = pmov %p3337_p13 }
  0x74   : > { %2125 = vsyncadd (%p3338_p3), [#allocation5], 4294967280 }
  0x75   : > { %327 = sfence }
  0x76   : > { %v372_v0 = vld [vmem:[%s2390_s8 + $0x20] sm:$0xff]  ;;  %v373_v2 = vld [vmem:[%s2390_s8 + $0x28] sm:$0xff]  ;;  %v374_v12 = vld [vmem:[%s2390_s8 + $0x30] sm:$0xff]  ;;  %vm739_vm0 = vcmask 31760   ;;  %vm513_vm1 = vcmask 15360   ;;  %s2155_s17 = smov 126  }
  0x77   : > { %v368_v1 = vld [vmem:[%s2390_s8] sm:$0xff]  ;;  %400 = vadd.xlane.f32.xlu1 %v372_v0  ;;  %v369_v3 = vld [vmem:[%s2390_s8 + $0x8] sm:$0xff]  ;;  %v370_v13 = vld [vmem:[%s2390_s8 + $0x10] sm:$0xff]  ;;  %s1733_s0 = smul.u32 1536, %s2227_s28  ;;  %s3145_s12 = scalar_lea.vmem [#allocation9], %s2386_s23 }
  0x78   : > { %392 = vadd.xlane.f32.xlu0 %v368_v1  ;;  %v377_v4 = vld [vmem:[%s2390_s8 + $0x48] sm:$0xff]  ;;  %v376_v5 = vld [vmem:[%s2390_s8 + $0x40] sm:$0xff]  ;;  %v382_v14 = vld [vmem:[%s2398_s10 + $0x10] sm:$0xff]  ;;  %s1522_s15 = sshll.u32 %s3145_s12, 4  ;;  %s1503_s18 = scalar_lea.sflag [#allocation4], %s2383_s26  ;;  %s3155_s15 = int_to_ptr.vmem [resolvable:$true] %s1522_s15 }
  0x79   : > { %v381_v6 = vld [vmem:[%s2398_s10 + $0x8] sm:$0xff]  ;;  %v380_v7 = vld [vmem:[%s2398_s10] sm:$0xff]  ;;  %v378_v15 = vld [vmem:[%s2390_s8 + $0x50] sm:$0xff]  ;;  %s3153_s9 = scalar_lea.hbm %s3277_s6, %s1733_s0  ;;  %s2042_s19 = scalar_lea.vmem %s3155_s15, 1536 }
  0x7a   : > { %v385_v8 = vld [vmem:[%s2398_s10 + $0x28] sm:$0xff]  ;;  %v384_v9 = vld [vmem:[%s2398_s10 + $0x20] sm:$0xff]  ;;  %v390_v16 = vld [vmem:[%s2398_s10 + $0x50] sm:$0xff]  ;;  %p2043_p8 = scmp.ne.s32.totalorder %s3155_s15, %s2042_s19  ;;  %p3383_p4 = scmp.ne.s32.totalorder %s3328_s13, 0 }
  0x7b   : > { %402 = vadd.xlane.f32.xlu1 %v373_v2  ;;  %v389_v10 = vld [vmem:[%s2398_s10 + $0x48] sm:$0xff]  ;;  %v388_v11 = vld [vmem:[%s2398_s10 + $0x40] sm:$0xff]  ;;  %v386_v17 = vld [vmem:[%s2398_s10 + $0x30] sm:$0xff]  ;;  %s2162_s22 = smov [#allocation9]  }
  0x7c   : > { %394 = vadd.xlane.f32.xlu0 %v369_v3  ;;  %v375_v18 = vld [vmem:[%s2390_s8 + $0x38] sm:$0xff]  ;;  %v2441_v43 = vld [vmem:[%s3273_s2] sm:$0xff]  ;;  %v2453_v46 = vld [vmem:[%s3273_s2 + $0x8] sm:$0xff]  ;;  %p2044_p11 = pnand %p2043_p8, %p3383_p4 }
  0x7d   : > { %v371_v19 = vld [vmem:[%s2390_s8 + $0x18] sm:$0xff]  ;;  %v2448_v45 = vld [vmem:[%s3273_s2 + $0x20] sm:$0xff]  ;;  %v2458_v47 = vld [vmem:[%s3273_s2 + $0x28] sm:$0xff] }
  0x7e   : > { %v383_v20 = vld [vmem:[%s2398_s10 + $0x18] sm:$0xff]  ;;  %v2471_v52 = vld [vmem:[%s3273_s2 + $0x10] sm:$0xff]  ;;  %p2045_p0 = pneg %p2044_p11 }
  0x7f   : > { %410 = vadd.xlane.f32.xlu1 %v377_v4  ;;  %v379_v21 = vld [vmem:[%s2390_s8 + $0x58] sm:$0xff]  ;;  %v2476_v53 = vld [vmem:[%s3273_s2 + $0x30] sm:$0xff] }
  0x80   : > { %408 = vadd.xlane.f32.xlu0 %v376_v5  ;;  %v391_v22 = vld [vmem:[%s2398_s10 + $0x58] sm:$0xff] }
  0x81   : > { %v387_v23 = vld [vmem:[%s2398_s10 + $0x38] sm:$0xff] }
  0x83   : > { %430 = vadd.xlane.f32.xlu1 %v381_v6 }
  0x84   : > { %428 = vadd.xlane.f32.xlu0 %v380_v7 }
  0x87   : > { %438 = vadd.xlane.f32.xlu1 %v385_v8 }
  0x88   : > { %436 = vadd.xlane.f32.xlu0 %v384_v9 }
  0x8b   : > { %446 = vadd.xlane.f32.xlu1 %v389_v10 }
  0x8c   : > { %444 = vadd.xlane.f32.xlu0 %v388_v11 }
  0x8f   : > { %404 = vadd.xlane.f32.xlu1 %v374_v12 }
  0x90   : > { %396 = vadd.xlane.f32.xlu0 %v370_v13 }
  0x93   : > { %432 = vadd.xlane.f32.xlu1 %v382_v14 }
  0x94   : > { %412 = vadd.xlane.f32.xlu0 %v378_v15 }
  0x97   : > { %448 = vadd.xlane.f32.xlu1 %v390_v16 }
  0x98   : > { %440 = vadd.xlane.f32.xlu0 %v386_v17 }
  0x9b   : > { %406 = vadd.xlane.f32.xlu1 %v375_v18 }
  0x9c   : > { %398 = vadd.xlane.f32.xlu0 %v371_v19 }
  0x9f   : > { %434 = vadd.xlane.f32.xlu1 %v383_v20 }
  0xa0   : > { %414 = vadd.xlane.f32.xlu0 %v379_v21 }
  0xa3   : > { %450 = vadd.xlane.f32.xlu1 %v391_v22 }
  0xa4   : > { %442 = vadd.xlane.f32.xlu0 %v387_v23 }
 0x104   : > { %v401_v24 = vpop.xlane.xlu1 %400 }
 0x105   : > { %v393_v25 = vpop.xlane.xlu0 %392  ;;  %v2462_v49 = vmul.f32 0.01, %v401_v24 }
 0x106   : > { %v2436_v42 = vmul.f32 0.01, %v393_v25 }
 0x107   : > { %v707_v4 = vmul.f32 %v2441_v43, %v2462_v49 }
 0x108   : > { %v403_v26 = vpop.xlane.xlu1 %402  ;;  %v703_v56 = vmul.f32 %v2441_v43, %v2436_v42 }
 0x109   : > { %v395_v27 = vpop.xlane.xlu0 %394  ;;  %v2486_v60 = vmul.f32 0.01, %v403_v26 }
 0x10a   : > { %v2443_v44 = vmul.f32 0.01, %v395_v27 }
 0x10b   : > { %v708_v14 = vmul.f32 %v2453_v46, %v2486_v60 }
 0x10c   : > { %v411_v28 = vpop.xlane.xlu1 %410  ;;  %v704_v61 = vmul.f32 %v2453_v46, %v2443_v44 }
 0x10d   : > { %v409_v29 = vpop.xlane.xlu0 %408  ;;  %v2494_v0 = vmul.f32 0.01, %v411_v28 }
 0x10e   : > { %v2496_v1 = vmul.f32 0.01, %v409_v29 }
 0x10f   : > { %v712_v18 = vmul.f32 %v2453_v46, %v2494_v0 }
 0x110   : > { %v431_v30 = vpop.xlane.xlu1 %430  ;;  %v711_v19 = vmul.f32 %v2441_v43, %v2496_v1 }
 0x111   : > { %v429_v31 = vpop.xlane.xlu0 %428  ;;  %v2432_v38 = vmul.f32 0.01, %v431_v30 }
 0x112   : > { %v2434_v39 = vmul.f32 0.01, %v429_v31  ;;  %v2539_v31 = vld [vmem:[%s3273_s2 + $0x18] sm:$0xff] }
 0x113   : > { %v716_v50 = vmul.f32 %v2458_v47, %v2432_v38 }
 0x114   : > { %v439_v32 = vpop.xlane.xlu1 %438  ;;  %v715_v51 = vmul.f32 %v2448_v45, %v2434_v39 }
 0x115   : > { %v437_v33 = vpop.xlane.xlu0 %436  ;;  %v2490_v62 = vmul.f32 0.01, %v439_v32  ;;  %v728_v5 = vadd.f32 %v716_v50, %v704_v61 }
 0x116   : > { %v2492_v63 = vmul.f32 0.01, %v437_v33  ;;  %v727_v6 = vadd.f32 %v715_v51, %v703_v56 }
 0x117   : > { %v720_v15 = vmul.f32 %v2458_v47, %v2490_v62  ;;  %v741_v22 = vsel %vm739_vm0, %v728_v5, 0.0 }
 0x118   : > { %v447_v34 = vpop.xlane.xlu1 %446  ;;  %v719_v16 = vmul.f32 %v2448_v45, %v2492_v63  ;;  %v740_v23 = vsel %vm739_vm0, %v727_v6, 0.0 }
 0x119   : > { %v445_v35 = vpop.xlane.xlu0 %444  ;;  %v2480_v57 = vmul.f32 0.01, %v447_v34  ;;  %v732_v32 = vadd.f32 %v720_v15, %v708_v14 }
 0x11a   : > { %v2482_v58 = vmul.f32 0.01, %v445_v35  ;;  %v731_v33 = vadd.f32 %v719_v16, %v707_v4 }
 0x11b   : > { %v724_v10 = vmul.f32 %v2458_v47, %v2480_v57 }
 0x11c   : > { %v405_v36 = vpop.xlane.xlu1 %404  ;;  %v723_v11 = vmul.f32 %v2448_v45, %v2482_v58 }
 0x11d   : > { %v397_v37 = vpop.xlane.xlu0 %396  ;;  %v2520_v17 = vmul.f32 0.01, %v405_v36  ;;  %v736_v28 = vadd.f32 %v724_v10, %v712_v18  ;;  %v742_v36 = vadd.f32 %v741_v22, %v740_v23  ;;  %v754_v10 = vsel %vm739_vm0, %v732_v32, 0.0 }
 0x11e   : > { %v2484_v59 = vmul.f32 0.01, %v397_v37  ;;  %v735_v29 = vadd.f32 %v723_v11, %v711_v19 }
 0x11f   : > { %v709_v34 = vmul.f32 %v2471_v52, %v2520_v17  ;;  %v767_v4 = vsel %vm739_vm0, %v736_v28, 0.0 }
 0x120   : > { %v433_v40 = vpop.xlane.xlu1 %432  ;;  %v705_v12 = vmul.f32 %v2471_v52, %v2484_v59  ;;  %v766_v5 = vsel %vm739_vm0, %v735_v29, 0.0  ;;  %v559_v29 = vlaneseq }
 0x121   : > { %v413_v41 = vpop.xlane.xlu0 %412  ;;  %v2460_v48 = vmul.f32 0.01, %v433_v40  ;;  %v768_v19 = vadd.f32 %v767_v4, %v766_v5 }
 0x122   : > { %v2512_v13 = vmul.f32 0.01, %v413_v41  ;;  %v2549_v41 = vld [vmem:[%s3273_s2 + $0x38] sm:$0xff]  ;;  %v560_v4 = vshrl.u32 %v559_v29, 7 }
 0x123   : > { %v717_v2 = vmul.f32 %v2476_v53, %v2460_v48 }
 0x124   : > { %v449_v54 = vpop.xlane.xlu1 %448  ;;  %v713_v30 = vmul.f32 %v2471_v52, %v2512_v13 }
 0x125   : > { %v441_v55 = vpop.xlane.xlu0 %440  ;;  %v2500_v3 = vmul.f32 0.01, %v449_v54  ;;  %v729_v20 = vadd.f32 %v717_v2, %v705_v12 }
 0x126   : > { %v2504_v7 = vmul.f32 0.01, %v441_v55 }
 0x127   : > { %v725_v21 = vmul.f32 %v2476_v53, %v2500_v3  ;;  %v743_v37 = vsel %vm739_vm0, %v729_v20, 0.0 }
 0x128   : > { %v407_v8 = vpop.xlane.xlu1 %406  ;;  %v721_v24 = vmul.f32 %v2476_v53, %v2504_v7  ;;  %v744_v11 = vadd.f32 %v743_v37, %v742_v36  ;;  %v477_v36 = vmul.f32 %v2441_v43, %v2434_v39 }
 0x129   : > { %v399_v9 = vpop.xlane.xlu0 %398  ;;  %v737_v40 = vadd.f32 %v725_v21, %v713_v30  ;;  %v2553_v54 = vmul.f32 0.01, %v407_v8  ;;  %v753_v8 = vsel %vm739_vm0, %v731_v33, 0.0 }
 0x12a   : > { %v2532_v25 = vmul.f32 0.01, %v399_v9  ;;  %v733_v51 = vadd.f32 %v721_v24, %v709_v34  ;;  %v755_v23 = vadd.f32 %v754_v10, %v753_v8  ;;  %v478_v34 = vmul.f32 %v2453_v46, %v2432_v38 }
 0x12b   : > { %v769_v14 = vsel %vm739_vm0, %v737_v40, 0.0  ;;  %v710_v21 = vmul.f32 %v2539_v31, %v2553_v54 }
 0x12c   : > { %v435_v26 = vpop.xlane.xlu1 %434  ;;  %v706_v55 = vmul.f32 %v2539_v31, %v2532_v25  ;;  %v756_v20 = vsel %vm739_vm0, %v733_v51, 0.0 }
 0x12d   : > { %v415_v27 = vpop.xlane.xlu0 %414  ;;  %v2543_v35 = vmul.f32 0.01, %v435_v26  ;;  %v757_v30 = vadd.f32 %v756_v20, %v755_v23 }
 0x12e   : > { %v2551_v50 = vmul.f32 0.01, %v415_v27  ;;  %v770_v27 = vadd.f32 %v769_v14, %v768_v19  ;;  %v493_v14 = vmul.f32 %v2448_v45, %v2462_v49  ;;  %v2603_v49 = vld [vmem:[%s3275_s4] sm:$0x1] }
 0x12f   : > { %v718_v56 = vmul.f32 %v2549_v41, %v2543_v35 }
 0x130   : > { %v451_v61 = vpop.xlane.xlu1 %450  ;;  %v714_v15 = vmul.f32 %v2539_v31, %v2551_v50 }
 0x131   : > { %v443_v2 = vpop.xlane.xlu0 %442  ;;  %v2561_v6 = vmul.f32 0.01, %v451_v61  ;;  %v730_v12 = vadd.f32 %v718_v56, %v706_v55  ;;  %v489_v56 = vmul.f32 %v2448_v45, %v2436_v42  ;;  %v490_v61 = vmul.f32 %v2458_v47, %v2443_v44 }
 0x132   : > { %v2563_v9 = vmul.f32 0.01, %v443_v2  ;;  %v494_v42 = vmul.f32 %v2458_v47, %v2486_v60  ;;  %v482_v44 = vmul.f32 %v2453_v46, %v2490_v62  ;;  %v498_v60 = vmul.f32 %v2458_v47, %v2494_v0 }
 0x133   : > { %v726_v16 = vmul.f32 %v2549_v41, %v2561_v6  ;;  %v745_v22 = vsel %vm739_vm0, %v730_v12, 0.0  ;;  %v502_v8 = vadd.f32 %v490_v61, %v478_v34  ;;  %v501_v38 = vadd.f32 %v489_v56, %v477_v36 }
 0x134   : > { %v722_v18 = vmul.f32 %v2549_v41, %v2563_v9  ;;  %v746_v24 = vadd.f32 %v745_v22, %v744_v11  ;;  %v479_v22 = vmul.f32 %v2471_v52, %v2460_v48  ;;  %v481_v62 = vmul.f32 %v2441_v43, %v2492_v63 }
 0x135   : > { %v738_v26 = vadd.f32 %v726_v16, %v714_v15  ;;  %v2590_v16 = vsub.s32 0, %v560_v4  ;;  %v515_v20 = vsel %vm513_vm1, %v502_v8, 0.0  ;;  %v491_v48 = vmul.f32 %v2476_v53, %v2484_v59 }
 0x136   : > { %v734_v28 = vadd.f32 %v722_v18, %v710_v21  ;;  %v747_v32 = vrot.slane %v746_v24, 4  ;;  %v514_v21 = vsel %vm513_vm1, %v501_v38, 0.0  ;;  %v483_v63 = vmul.f32 %v2471_v52, %v2504_v7  ;;  %v2629_v7 = vld [vmem:[%s3274_s3 + $0x8] sm:$0xff] }
 0x137   : > { %v771_v33 = vsel %vm739_vm0, %v738_v26, 0.0  ;;  %v503_v0 = vadd.f32 %v491_v48, %v479_v22  ;;  %v492_v34 = vmul.f32 %v2549_v41, %v2532_v25  ;;  %v486_v59 = vmul.f32 %v2453_v46, %v2480_v57  ;;  %v2634_v25 = vld [vmem:[%s3274_s3] sm:$0xff] }
 0x138   : > { %v772_v37 = vadd.f32 %v771_v33, %v770_v27  ;;  %v758_v40 = vsel %vm739_vm0, %v734_v28, 0.0  ;;  %v748_v51 = vadd.f32 %v747_v32, %v746_v24  ;;  %v497_v27 = vmul.f32 %v2448_v45, %v2496_v1 }
 0x139   : > { %v759_v55 = vadd.f32 %v758_v40, %v757_v30  ;;  %v480_v28 = vmul.f32 %v2539_v31, %v2543_v35  ;;  %v516_v30 = vadd.f32 %v515_v20, %v514_v21  ;;  %v506_v32 = vadd.f32 %v494_v42, %v482_v44 }
 0x13a   : > { %v773_v2 = vrot.slane %v772_v37, 4  ;;  %v749_v5 = vrot.slane %v748_v51, 2  ;;  %v505_v1 = vadd.f32 %v493_v14, %v481_v62  ;;  %v517_v56 = vsel %vm513_vm1, %v503_v0, 0.0  ;;  %v2692_v0 = vld [vmem:[%s3274_s3 + $0x18] sm:$0xff] }
 0x13b   : > { %v760_v10 = vrot.slane %v759_v55, 4  ;;  %v504_v40 = vadd.f32 %v492_v34, %v480_v28  ;;  %v528_v57 = vsel %vm513_vm1, %v506_v32, 0.0  ;;  %v510_v8 = vadd.f32 %v498_v60, %v486_v59 }
 0x13c   : > { %v774_v11 = vadd.f32 %v773_v2, %v772_v37  ;;  %v750_v39 = vadd.f32 %v749_v5, %v748_v51  ;;  %v495_v37 = vmul.f32 %v2476_v53, %v2520_v17  ;;  %v484_v51 = vmul.f32 %v2539_v31, %v2563_v9 }
 0x13d   : > { %v761_v12 = vadd.f32 %v760_v10, %v759_v55  ;;  %v485_v17 = vmul.f32 %v2441_v43, %v2482_v58  ;;  %v496_v2 = vmul.f32 %v2549_v41, %v2553_v54  ;;  %v527_v5 = vsel %vm513_vm1, %v505_v1, 0.0 }
 0x13e   : > { %v775_v15 = vrot.slane %v774_v11, 2  ;;  %v751_v18 = vrot.slane %v750_v39, 1  ;;  %v507_v61 = vadd.f32 %v495_v37, %v483_v63  ;;  %v519_v38 = vsel %vm513_vm1, %v504_v40, 0.0 }
 0x13f   : > { %v762_v19 = vrot.slane %v761_v12, 2  ;;  %v487_v54 = vmul.f32 %v2471_v52, %v2500_v3  ;;  %v488_v44 = vmul.f32 %v2539_v31, %v2561_v6  ;;  %v499_v20 = vmul.f32 %v2476_v53, %v2512_v13 }
 0x140   : > { %v776_v23 = vadd.f32 %v775_v15, %v774_v11  ;;  %v752_v24 = vadd.f32 %v751_v18, %v750_v39  ;;  %v508_v11 = vadd.f32 %v496_v2, %v484_v51  ;;  %v509_v15 = vadd.f32 %v497_v27, %v485_v17 }
 0x141   : > { %v763_v26 = vadd.f32 %v762_v19, %v761_v12  ;;  %v518_v12 = vadd.f32 %v517_v56, %v516_v30  ;;  %v530_v42 = vsel %vm513_vm1, %v507_v61, 0.0  ;;  %v529_v19 = vadd.f32 %v528_v57, %v527_v5 }
 0x142   : > { %v777_v29 = vrot.slane %v776_v23, 1  ;;  %v779_v47 = vadd.f32 %v752_v24, %v2603_v49  ;;  %v500_v21 = vmul.f32 %v2549_v41, %v2551_v50  ;;  %v532_v22 = vsel %vm513_vm1, %v508_v11, 0.0 }
 0x143   : > { %v764_v33 = vrot.slane %v763_v26, 1  ;;  %v520_v52 = vadd.f32 %v519_v38, %v518_v12  ;;  %v511_v31 = vadd.f32 %v499_v20, %v487_v54  ;;  %v531_v6 = vadd.f32 %v530_v42, %v529_v19 }
 0x144   : > { %v778_v45 = vadd.f32 %v777_v29, %v776_v23  ;;  %v782_v35 = vmax.f32 %v779_v47, 0.0  ;;  %v2672_v23 = vld [vmem:[%s3274_s3 + $0x10] sm:$0xff]  ;;  %v541_v53 = vsel %vm513_vm1, %v510_v8, 0.0  ;;  %v540_v13 = vsel %vm513_vm1, %v509_v15, 0.0 }
 0x145   : > { %v765_v36 = vadd.f32 %v764_v33, %v763_v26  ;;  %v512_v60 = vadd.f32 %v500_v21, %v488_v44  ;;  %v521_v62 = vrot.slane %v520_v52, 4  ;;  %v533_v41 = vadd.f32 %v532_v22, %v531_v6 }
 0x146   : > { %v781_v46 = vadd.f32 %v778_v45, %v2603_v49  ;;  %v2641_v55 = vrot.slane %v782_v35, %v2590_v16  ;;  %v543_v26 = vsel %vm513_vm1, %v511_v31, 0.0  ;;  %v542_v27 = vadd.f32 %v541_v53, %v540_v13 }
 0x147   : > { %v780_v9 = vadd.f32 %v765_v36, %v2603_v49  ;;  %v545_v48 = vsel %vm513_vm1, %v512_v60, 0.0  ;;  %v522_v28 = vadd.f32 %v521_v62, %v520_v52  ;;  %v534_v29 = vrot.slane %v533_v41, 4 }
 0x148   : > { %v784_v4 = vmax.f32 %v781_v46, 0.0  ;;  %v798_v10 = vmul.f32 %v2641_v55, %v2629_v7  ;;  %v797_v43 = vmul.f32 %v2641_v55, %v2634_v25  ;;  %v799_v50 = vmul.f32 %v2641_v55, %v2672_v23 }
 0x149   : > { %v783_v58 = vmax.f32 %v780_v9, 0.0  ;;  %v544_v33 = vadd.f32 %v543_v26, %v542_v27  ;;  %v2156_v63 = vmov 6   ;;  %v523_v34 = vrot.slane %v522_v28, 2 }
 0x14a   : > { %v796_v39 = vrot.slane %v784_v4, %v2590_v16  ;;  %823 = vrot.lane.b32.xlu1 %v798_v10, %s2155_s17  ;;  %821 = vrot.lane.b32.xlu0 %v797_v43, %s2155_s17  ;;  %v535_v45 = vadd.f32 %v534_v29, %v533_v41  ;;  %v800_v40 = vmul.f32 %v2641_v55, %v2692_v0 }
 0x14b   : > { %v792_v14 = vrot.slane %v783_v58, %v2590_v16  ;;  %v546_v47 = vadd.f32 %v545_v48, %v544_v33  ;;  %1816 = vset.pattern.permute.xlu1 %v2156_v63  ;;  %v524_v36 = vadd.f32 %v523_v34, %v522_v28  ;;  %v2157_v58 = vmov 7  }
 0x14c   : > { %v805_v18 = vmul.f32 %v796_v39, %v2634_v25  ;;  %v807_v30 = vmul.f32 %v796_v39, %v2672_v23  ;;  %v806_v32 = vmul.f32 %v796_v39, %v2629_v7  ;;  %v536_v37 = vrot.slane %v535_v45, 2  ;;  %1817 = vset.pattern.permute.xlu0 %v2157_v58 }
 0x14d   : > { %v801_v3 = vmul.f32 %v792_v14, %v2634_v25  ;;  %v802_v24 = vmul.f32 %v792_v14, %v2629_v7  ;;  %v804_v1 = vmul.f32 %v792_v14, %v2692_v0  ;;  %v803_v59 = vmul.f32 %v792_v14, %v2672_v23 }
 0x14e   : > { %837 = vrot.lane.b32.xlu0 %v805_v18, %s2155_s17  ;;  %v547_v35 = vrot.slane %v546_v47, 4  ;;  %v525_v51 = vrot.slane %v524_v36, 1  ;;  %v537_v57 = vadd.f32 %v536_v37, %v535_v45  ;;  %v808_v17 = vmul.f32 %v796_v39, %v2692_v0 }
 0x14f   : > { %829 = vrot.lane.b32.xlu1 %v801_v3, %s2155_s17 }
 0x150   : > { %v548_v46 = vadd.f32 %v547_v35, %v546_v47  ;;  %v526_v9 = vadd.f32 %v525_v51, %v524_v36  ;;  %v538_v61 = vrot.slane %v537_v57, 1 }
 0x152   : > { %825 = vrot.lane.b32.xlu0 %v799_v50, %s2155_s17  ;;  %v549_v56 = vrot.slane %v548_v46, 2  ;;  %v539_v4 = vadd.f32 %v538_v61, %v537_v57  ;;  %v553_v5 = vadd.f32 %v526_v9, %v2603_v49 }
 0x153   : > { %831 = vrot.lane.b32.xlu1 %v802_v24, %s2155_s17 }
 0x154   : > { %v550_v2 = vadd.f32 %v549_v56, %v548_v46  ;;  %v556_v43 = vmax.f32 %v553_v5, 0.0  ;;  %v554_v55 = vadd.f32 %v539_v4, %v2603_v49  ;;  %v2158_v4 = vmov 8  }
 0x155   : > { %v2159_v5 = vmov 9  }
 0x156   : > { %841 = vrot.lane.b32.xlu0 %v807_v30, %s2155_s17  ;;  %v551_v10 = vrot.slane %v550_v2, 1  ;;  %v562_v38 = vrot.slane %v556_v43, %v2590_v16  ;;  %v557_v11 = vmax.f32 %v554_v55, 0.0 }
 0x157   : > { %839 = vrot.lane.b32.xlu1 %v806_v32, %s2155_s17 }
 0x158   : > { %v552_v8 = vadd.f32 %v551_v10, %v550_v2  ;;  %v571_v39 = vmul.f32 %v562_v38, %v2634_v25  ;;  %v566_v12 = vrot.slane %v557_v11, %v2590_v16  ;;  %v573_v21 = vmul.f32 %v562_v38, %v2672_v23 }
 0x159   : > { %v574_v62 = vmul.f32 %v562_v38, %v2692_v0  ;;  %v2160_v10 = vmov 4  }
 0x15a   : > { %835 = vrot.lane.b32.xlu0 %v804_v1, %s2155_s17  ;;  %v555_v54 = vadd.f32 %v552_v8, %v2603_v49  ;;  %v583_v14 = vsel %vm513_vm1, %v571_v39, 0.0  ;;  %v575_v15 = vmul.f32 %v566_v12, %v2634_v25  ;;  %v576_v18 = vmul.f32 %v566_v12, %v2629_v7 }
 0x15b   : > { %833 = vrot.lane.b32.xlu1 %v803_v59, %s2155_s17  ;;  %v572_v49 = vmul.f32 %v562_v38, %v2629_v7  ;;  %v577_v13 = vmul.f32 %v566_v12, %v2672_v23  ;;  %v578_v50 = vmul.f32 %v566_v12, %v2692_v0  ;;  %v592_v24 = vsel %vm513_vm1, %v574_v62, 0.0 }
 0x15c   : > { %v558_v42 = vmax.f32 %v555_v54, 0.0  ;;  %v595_v44 = vsel %vm513_vm1, %v575_v15, 0.0  ;;  %v598_v20 = vsel %vm513_vm1, %v576_v18, 0.0 }
 0x15d   : > { %v586_v22 = vsel %vm513_vm1, %v572_v49, 0.0  ;;  %v601_v41 = vsel %vm513_vm1, %v577_v13, 0.0  ;;  %v604_v27 = vsel %vm513_vm1, %v578_v50, 0.0 }
 0x15e   : > { %v570_v19 = vrot.slane %v558_v42, %v2590_v16  ;;  %v589_v16 = vsel %vm513_vm1, %v573_v21, 0.0 }
 0x15f   : > { %827 = vrot.lane.b32.xlu1 %v800_v40, %s2155_s17 }
 0x160   : > { %v579_v52 = vmul.f32 %v570_v19, %v2634_v25  ;;  %v580_v31 = vmul.f32 %v570_v19, %v2629_v7  ;;  %v581_v6 = vmul.f32 %v570_v19, %v2672_v23  ;;  %v582_v26 = vmul.f32 %v570_v19, %v2692_v0 }
 0x162   : > { %v607_v3 = vsel %vm513_vm1, %v579_v52, 0.0  ;;  %v610_v53 = vsel %vm513_vm1, %v580_v31, 0.0  ;;  %v613_v60 = vsel %vm513_vm1, %v581_v6, 0.0  ;;  %v616_v48 = vsel %vm513_vm1, %v582_v26, 0.0 }
 0x163   : > { %843 = vrot.lane.b32.xlu1 %v808_v17, %s2155_s17  ;;  %s2046_s17 = sshll.u32 %s2162_s22, 4  ;;  %s2047_s17 = int_to_ptr.vmem [resolvable:$false] %s2046_s17 }
 0x164   : > { %s2048_s29 = scalar_lea.vmem %s2047_s17, 3072  ;;  %p2049_p2 = scmp.lt.s32.totalorder %s3155_s15, %s2047_s17 }
 0x165   : > { %p2050_p7 = scmp.lt.s32.totalorder %s2048_s29, %s2042_s19 }
 0x167   : > { %p2051_p6 = por %p2050_p7, %p2049_p2 }
 0x169   : > { %p2052_p12 = pnand %p2051_p6, %p2045_p0 }
 0x179   : > { %584 = vadd.xlane.f32.xlu0 %v583_v14 }
 0x17d   : > { %596 = vadd.xlane.f32.xlu0 %v595_v44 }
 0x181   : > { %599 = vadd.xlane.f32.xlu0 %v598_v20 }
 0x185   : > { %608 = vadd.xlane.f32.xlu0 %v607_v3 }
 0x187   : > { %587 = vadd.xlane.f32.xlu1 %v586_v22 }
 0x189   : > { %590 = vadd.xlane.f32.xlu0 %v589_v16 }
 0x18b   : > { %611 = vadd.xlane.f32.xlu1 %v610_v53 }
 0x18d   : > { %614 = vadd.xlane.f32.xlu0 %v613_v60 }
 0x18f   : > { %602 = vadd.xlane.f32.xlu1 %v601_v41 }
 0x191   : > { %593 = vadd.xlane.f32.xlu0 %v592_v24 }
 0x193   : > { %605 = vadd.xlane.f32.xlu1 %v604_v27 }
 0x195   : > { %617 = vadd.xlane.f32.xlu0 %v616_v48 }
 0x1bc   : > { %v824_v28 = vpop.permute.xlu1 %823  ;;  %v822_v29 = vpop.permute.xlu0 %821 }
 0x1bd   : > { %v860_v30 = vsel %vm513_vm1, %v824_v28, 0.0  ;;  %v857_v32 = vsel %vm513_vm1, %v822_v29, 0.0 }
 0x1be   : > { %861 = vadd.xlane.f32.xlu1 %v860_v30  ;;  %858 = vadd.xlane.f32.xlu0 %v857_v32 }
 0x1c0   : > { %v838_v47 = vpop.permute.xlu0 %837 }
 0x1c1   : > { %v830_v33 = vpop.permute.xlu1 %829  ;;  %v881_v36 = vsel %vm513_vm1, %v838_v47, 0.0 }
 0x1c2   : > { %v869_v34 = vsel %vm513_vm1, %v830_v33, 0.0 }
 0x1c3   : > { %870 = vadd.xlane.f32.xlu0 %v869_v34 }
 0x1c4   : > { %v826_v1 = vpop.permute.xlu0 %825 }
 0x1c5   : > { %v832_v45 = vpop.permute.xlu1 %831  ;;  %v863_v57 = vsel %vm513_vm1, %v826_v1, 0.0 }
 0x1c6   : > { %v872_v59 = vsel %vm513_vm1, %v832_v45, 0.0 }
 0x1c7   : > { %873 = vadd.xlane.f32.xlu1 %v872_v59  ;;  %882 = vadd.xlane.f32.xlu0 %v881_v36 }
 0x1c8   : > { %v842_v37 = vpop.permute.xlu0 %841 }
 0x1c9   : > { %v840_v35 = vpop.permute.xlu1 %839  ;;  %v887_v9 = vsel %vm513_vm1, %v842_v37, 0.0 }
 0x1ca   : > { %v884_v40 = vsel %vm513_vm1, %v840_v35, 0.0 }
 0x1cb   : > { %885 = vadd.xlane.f32.xlu1 %v884_v40  ;;  %v2161_v40 = vmov 5  }
 0x1cc   : > { %v836_v17 = vpop.permute.xlu0 %835 }
 0x1cd   : > { %v834_v51 = vpop.permute.xlu1 %833  ;;  %v878_v56 = vsel %vm513_vm1, %v836_v17, 0.0 }
 0x1ce   : > { %v875_v46 = vsel %vm513_vm1, %v834_v51, 0.0 }
 0x1cf   : > { %876 = vadd.xlane.f32.xlu0 %v875_v46  ;;  %864 = vadd.xlane.f32.xlu1 %v863_v57 }
 0x1d1   : > { %v828_v61 = vpop.permute.xlu1 %827 }
 0x1d2   : > { %v866_v2 = vsel %vm513_vm1, %v828_v61, 0.0 }
 0x1d3   : > { %888 = vadd.xlane.f32.xlu1 %v887_v9  ;;  %879 = vadd.xlane.f32.xlu0 %v878_v56 }
 0x1d5   : > { %v844_v42 = vpop.permute.xlu1 %843 }
 0x1d6   : > { %v890_v53 = vsel %vm513_vm1, %v844_v42, 0.0 }
 0x1d7   : > { %867 = vadd.xlane.f32.xlu1 %v866_v2 }
 0x1e8   : > { %1149 = vperm.xlu1 %1816, %v2634_v25  }
 0x1e9   : > { %1180 = vperm.xlu0 %1817, %v2634_v25  }
 0x1ec   : > { %1154 = vperm.xlu1 %1816, %v2629_v7  }
 0x1ed   : > { %1820 = vset.pattern.permute.xlu0 %v2158_v4 }
 0x1ee   : > { %1255 = vperm.xlu0 %1820, %v2629_v7  }
 0x1f0   : > { %1818 = vset.pattern.permute.xlu1 %v2157_v58 }
 0x1f1   : > { %1184 = vperm.xlu1 %1818, %v2629_v7  }
 0x1f2   : > { %1822 = vset.pattern.permute.xlu0 %v2156_v63 }
 0x1f3   : > { %1159 = vperm.xlu0 %1822, %v2672_v23  }
 0x1f5   : > { %1819 = vset.pattern.permute.xlu1 %v2158_v4 }
 0x1f6   : > { %1251 = vperm.xlu1 %1819, %v2634_v25  }
 0x1f7   : > { %1825 = vset.pattern.permute.xlu0 %v2159_v5 }
 0x1f8   : > { %1287 = vperm.xlu0 %1825, %v2672_v23  }
 0x1fa   : > { %1821 = vset.pattern.permute.xlu1 %v2159_v5 }
 0x1fb   : > { %1279 = vperm.xlu1 %1821, %v2634_v25  }
 0x1fc   : > { %1828 = vset.pattern.permute.xlu0 %v2160_v10 }
 0x1ff   : > { %1283 = vperm.xlu1 %1821, %v2629_v7  }
 0x203   : > { %1823 = vset.pattern.permute.xlu1 %v2157_v58 }
 0x204   : > { %1188 = vperm.xlu1 %1823, %v2672_v23  }
 0x206   : > { %v585_v43 = vpop.xlane.xlu0 %584 }
 0x207   : > { %v619_v55 = vadd.f32 %v585_v43, %v2634_v25 }
 0x208   : > { %1824 = vset.pattern.permute.xlu1 %v2158_v4 }
 0x209   : > { %1259 = vperm.xlu1 %1824, %v2672_v23   ;;  %v1689_v8 = vmul.f32 -1.442695, %v619_v55 }
 0x20a   : > { %v597_v38 = vpop.xlane.xlu0 %596 }
 0x20b   : > { %1835 = vpow2.f32 %v1689_v8  ;;  %v623_v16 = vadd.f32 %v597_v38, %v2634_v25 }
 0x20d   : > { %1826 = vset.pattern.permute.xlu1 %v2156_v63  ;;  %v1693_v62 = vmul.f32 -1.442695, %v623_v16 }
 0x20e   : > { %1164 = vperm.xlu1 %1826, %v2692_v0   ;;  %v600_v11 = vpop.xlane.xlu0 %599 }
 0x20f   : > { %v624_v41 = vadd.f32 %v600_v11, %v2629_v7 }
 0x211   : > { %v1694_v26 = vmul.f32 -1.442695, %v624_v41 }
 0x212   : > { %1827 = vset.pattern.permute.xlu1 %v2157_v58  ;;  %v609_v39 = vpop.xlane.xlu0 %608 }
 0x213   : > { %v627_v29 = vadd.f32 %v609_v39, %v2634_v25 }
 0x214   : > { %v588_v18 = vpop.xlane.xlu1 %587 }
 0x215   : > { %v1836_v12 = vpop.eup %1835  ;;  %v620_v52 = vadd.f32 %v588_v18, %v2629_v7  ;;  %v1697_v45 = vmul.f32 -1.442695, %v627_v29 }
 0x216   : > { %v667_v54 = vadd.f32 1.0, %v1836_v12  ;;  %v591_v14 = vpop.xlane.xlu0 %590 }
 0x217   : > { %v1690_v3 = vmul.f32 -1.442695, %v620_v52  ;;  %v621_v58 = vadd.f32 %v591_v14, %v2672_v23 }
 0x218   : > { %1837 = vrcp.f32 %v667_v54  ;;  %v612_v31 = vpop.xlane.xlu1 %611 }
 0x219   : > { %v1691_v21 = vmul.f32 -1.442695, %v621_v58  ;;  %v628_v34 = vadd.f32 %v612_v31, %v2629_v7 }
 0x21a   : > { %v615_v15 = vpop.xlane.xlu0 %614 }
 0x21b   : > { %v629_v36 = vadd.f32 %v615_v15, %v2672_v23  ;;  %v1698_v35 = vmul.f32 -1.442695, %v628_v34 }
 0x21c   : > { %v603_v50 = vpop.xlane.xlu1 %602 }
 0x21d   : > { %v625_v27 = vadd.f32 %v603_v50, %v2672_v23  ;;  %v1699_v57 = vmul.f32 -1.442695, %v629_v36 }
 0x21e   : > { %v594_v44 = vpop.xlane.xlu0 %593 }
 0x21f   : > { %v622_v22 = vadd.f32 %v594_v44, %v2692_v0  ;;  %v1695_v30 = vmul.f32 -1.442695, %v625_v27 }
 0x220   : > { %v606_v37 = vpop.xlane.xlu1 %605 }
 0x221   : > { %v1692_v6 = vmul.f32 -1.442695, %v622_v22  ;;  %v626_v9 = vadd.f32 %v606_v37, %v2692_v0 }
 0x222   : > { %v1838_v19 = vpop.eup %1837  ;;  %v618_v20 = vpop.xlane.xlu0 %617 }
 0x223   : > { %v630_v63 = vadd.f32 %v618_v20, %v2692_v0  ;;  %979 = vperm.xlu0 %1828, %v1838_v19   ;;  %v1696_v43 = vmul.f32 -1.442695, %v626_v9 }
 0x225   : > { %v1700_v49 = vmul.f32 -1.442695, %v630_v63 }
 0x227   : > { %1839 = vpow2.f32 %v1700_v49 }
 0x228   : > { %1841 = vpow2.f32 %v1690_v3 }
 0x229   : > { %1843 = vpow2.f32 %v1691_v21 }
 0x22a   : > { %1845 = vpow2.f32 %v1692_v6 }
 0x231   : > { %v1840_v13 = vpop.eup %1839 }
 0x232   : > { %891 = vadd.xlane.f32.xlu1 %v890_v53  ;;  %v678_v60 = vadd.f32 1.0, %v1840_v13  ;;  %v1842_v24 = vpop.eup %1841 }
 0x233   : > { %v668_v48 = vadd.f32 1.0, %v1842_v24  ;;  %v1844_v28 = vpop.eup %1843 }
 0x234   : > { %1847 = vrcp.f32 %v678_v60  ;;  %v669_v32 = vadd.f32 1.0, %v1844_v28  ;;  %v1846_v33 = vpop.eup %1845 }
 0x235   : > { %1849 = vpow2.f32 %v1693_v62  ;;  %v670_v1 = vadd.f32 1.0, %v1846_v33 }
 0x236   : > { %1851 = vpow2.f32 %v1694_v26 }
 0x237   : > { %1853 = vrcp.f32 %v668_v48 }
 0x238   : > { %1855 = vpow2.f32 %v1695_v30 }
 0x239   : > { %1857 = vrcp.f32 %v669_v32 }
 0x23a   : > { %1859 = vpow2.f32 %v1697_v45 }
 0x23b   : > { %1861 = vrcp.f32 %v670_v1 }
 0x23c   : > { %1863 = vpow2.f32 %v1698_v35 }
 0x23e   : > { %v1848_v47 = vpop.eup %1847 }
 0x23f   : > { %1034 = vperm.xlu0 %1828, %v1848_v47   ;;  %v1850_v59 = vpop.eup %1849 }
 0x240   : > { %v671_v51 = vadd.f32 1.0, %v1850_v59  ;;  %v1852_v46 = vpop.eup %1851 }
 0x241   : > { %v1854_v17 = vpop.eup %1853  ;;  %v672_v56 = vadd.f32 1.0, %v1852_v46 }
 0x242   : > { %1865 = vrcp.f32 %v671_v51  ;;  %v1856_v61 = vpop.eup %1855 }
 0x243   : > { %1192 = vperm.xlu1 %1827, %v2692_v0   ;;  %1830 = vset.pattern.permute.xlu0 %v2161_v40  ;;  %1867 = vpow2.f32 %v1699_v57  ;;  %v1858_v2 = vpop.eup %1857  ;;  %v673_v38 = vadd.f32 1.0, %v1856_v61 }
 0x244   : > { %1869 = vrcp.f32 %v672_v56  ;;  %v1860_v12 = vpop.eup %1859 }
 0x245   : > { %v1862_v54 = vpop.eup %1861  ;;  %1871 = vpow2.f32 %v1696_v43  ;;  %v675_v44 = vadd.f32 1.0, %v1860_v12 }
 0x246   : > { %v1864_v42 = vpop.eup %1863  ;;  %1873 = vrcp.f32 %v673_v38 }
 0x247   : > { %1829 = vset.pattern.permute.xlu1 %v2160_v10  ;;  %v676_v63 = vadd.f32 1.0, %v1864_v42 }
 0x248   : > { %984 = vperm.xlu1 %1829, %v1854_v17  }
 0x24b   : > { %v862_v55 = vpop.xlane.xlu1 %861  ;;  %v859_v8 = vpop.xlane.xlu0 %858 }
 0x24c   : > { %989 = vperm.xlu1 %1829, %v1858_v2   ;;  %v894_v11 = vadd.f32 %v862_v55, %v2629_v7  ;;  %v893_v39 = vadd.f32 %v859_v8, %v2634_v25  ;;  %v1866_v19 = vpop.eup %1865 }
 0x24d   : > { %v1868_v52 = vpop.eup %1867 }
 0x24e   : > { %v1702_v10 = vmul.f32 -1.442695, %v894_v11  ;;  %v1701_v14 = vmul.f32 -1.442695, %v893_v39  ;;  %v1870_v22 = vpop.eup %1869  ;;  %v677_v31 = vadd.f32 1.0, %v1868_v52 }
 0x24f   : > { %v1872_v13 = vpop.eup %1871 }
 0x250   : > { %994 = vperm.xlu1 %1829, %v1862_v54   ;;  %v871_v15 = vpop.xlane.xlu0 %870  ;;  %1875 = vpow2.f32 %v1701_v14  ;;  %v1874_v62 = vpop.eup %1873  ;;  %v674_v24 = vadd.f32 1.0, %v1872_v13 }
 0x251   : > { %v897_v18 = vadd.f32 %v871_v15, %v2634_v25  ;;  %1877 = vpow2.f32 %v1702_v10 }
 0x252   : > { %1879 = vrcp.f32 %v675_v44 }
 0x253   : > { %v1705_v20 = vmul.f32 -1.442695, %v897_v18 }
 0x254   : > { %v874_v49 = vpop.xlane.xlu1 %873  ;;  %999 = vperm.xlu1 %1829, %v1866_v19   ;;  %v883_v3 = vpop.xlane.xlu0 %882 }
 0x255   : > { %v898_v58 = vadd.f32 %v874_v49, %v2629_v7  ;;  %v901_v21 = vadd.f32 %v883_v3, %v2634_v25  ;;  %1881 = vpow2.f32 %v1705_v20 }
 0x256   : > { %1883 = vrcp.f32 %v676_v63 }
 0x257   : > { %v1706_v16 = vmul.f32 -1.442695, %v898_v58  ;;  %v1709_v6 = vmul.f32 -1.442695, %v901_v21 }
 0x258   : > { %v886_v53 = vpop.xlane.xlu1 %885  ;;  %1004 = vperm.xlu1 %1829, %v1870_v22  }
 0x259   : > { %1885 = vpow2.f32 %v1706_v16  ;;  %v902_v60 = vadd.f32 %v886_v53, %v2629_v7 }
 0x25a   : > { %1887 = vrcp.f32 %v677_v31  ;;  %v1876_v50 = vpop.eup %1875 }
 0x25b   : > { %v1710_v41 = vmul.f32 -1.442695, %v902_v60  ;;  %1889 = vpow2.f32 %v1709_v6  ;;  %v1878_v27 = vpop.eup %1877  ;;  %v941_v48 = vadd.f32 1.0, %v1876_v50 }
 0x25c   : > { %v865_v26 = vpop.xlane.xlu1 %864  ;;  %1009 = vperm.xlu1 %1829, %v1874_v62   ;;  %v877_v25 = vpop.xlane.xlu0 %876  ;;  %v942_v47 = vadd.f32 1.0, %v1878_v27 }
 0x25d   : > { %1891 = vpow2.f32 %v1710_v41  ;;  %v895_v28 = vadd.f32 %v865_v26, %v2672_v23  ;;  %v899_v29 = vadd.f32 %v877_v25, %v2672_v23  ;;  %v1880_v30 = vpop.eup %1879 }
 0x25e   : > { %1893 = vrcp.f32 %v941_v48 }
 0x25f   : > { %v1703_v32 = vmul.f32 -1.442695, %v895_v28  ;;  %v1707_v7 = vmul.f32 -1.442695, %v899_v29  ;;  %v1882_v33 = vpop.eup %1881  ;;  %1895 = vrcp.f32 %v674_v24 }
 0x260   : > { %v889_v34 = vpop.xlane.xlu1 %888  ;;  %1019 = vperm.xlu1 %1829, %v1880_v30   ;;  %v880_v45 = vpop.xlane.xlu0 %879  ;;  %v945_v37 = vadd.f32 1.0, %v1882_v33 }
 0x261   : > { %1897 = vpow2.f32 %v1703_v32  ;;  %v903_v1 = vadd.f32 %v889_v34, %v2672_v23  ;;  %v900_v59 = vadd.f32 %v880_v45, %v2692_v0  ;;  %v1884_v36 = vpop.eup %1883 }
 0x262   : > { %1899 = vpow2.f32 %v1707_v7 }
 0x263   : > { %v1886_v35 = vpop.eup %1885  ;;  %v1711_v51 = vmul.f32 -1.442695, %v903_v1  ;;  %1901 = vrcp.f32 %v942_v47  ;;  %v1708_v57 = vmul.f32 -1.442695, %v900_v59 }
 0x264   : > { %v946_v46 = vadd.f32 1.0, %v1886_v35  ;;  %v868_v17 = vpop.xlane.xlu1 %867  ;;  %1024 = vperm.xlu1 %1829, %v1884_v36   ;;  %v1888_v9 = vpop.eup %1887 }
 0x265   : > { %1903 = vpow2.f32 %v1711_v51  ;;  %v896_v56 = vadd.f32 %v868_v17, %v2692_v0  ;;  %v1890_v61 = vpop.eup %1889 }
 0x266   : > { %1905 = vrcp.f32 %v946_v46  ;;  %v949_v8 = vadd.f32 1.0, %v1890_v61 }
 0x267   : > { %v1892_v2 = vpop.eup %1891  ;;  %1907 = vrcp.f32 %v945_v37  ;;  %v1704_v23 = vmul.f32 -1.442695, %v896_v56 }
 0x268   : > { %v950_v43 = vadd.f32 1.0, %v1892_v2  ;;  %1909 = vpow2.f32 %v1708_v57  ;;  %1029 = vperm.xlu1 %1829, %v1888_v9   ;;  %v1894_v55 = vpop.eup %1893  ;;  %v2800_v31 = vpop.permute.xlu1 %1149  ;;  %v2843_v2 = vld [vmem:[%s2398_s10] sm:$0xff] }
 0x269   : > { %1911 = vpow2.f32 %v1704_v23  ;;  %v1896_v38 = vpop.eup %1895  ;;  %1063 = vperm.xlu0 %1830, %v1894_v55   ;;  %v2826_v1 = vpop.permute.xlu0 %1180  ;;  %3340 = vst [vmem:[#allocation20_spill] sm:$0xff] %v2843_v2  ;;  %v2849_v55 = vld [vmem:[%s2398_s10 + $0x58] sm:$0xff] }
 0x26a   : > { %1913 = vrcp.f32 %v950_v43 }
 0x26b   : > { %v1898_v11 = vpop.eup %1897  ;;  %1915 = vrcp.f32 %v949_v8 }
 0x26c   : > { %v943_v39 = vadd.f32 1.0, %v1898_v11  ;;  %1014 = vperm.xlu1 %1829, %v1896_v38   ;;  %v1900_v12 = vpop.eup %1899  ;;  %v2802_v16 = vpop.permute.xlu1 %1154  ;;  %v2853_v38 = vld [vmem:[%s2398_s10 + $0x8] sm:$0xff] }
 0x26d   : > { %v1902_v54 = vpop.eup %1901  ;;  %v947_v10 = vadd.f32 1.0, %v1900_v12  ;;  %3341 = vst [vmem:[#allocation21_spill] sm:$0xff] %v2853_v38  ;;  %v2857_v12 = vld [vmem:[%s2390_s8] sm:$0xff] }
 0x26e   : > { %1917 = vrcp.f32 %v943_v39  ;;  %3342 = vst [vmem:[#allocation22_spill] sm:$0xff] %v2857_v12 }
 0x26f   : > { %v1904_v14 = vpop.eup %1903  ;;  %1919 = vrcp.f32 %v947_v10  ;;  %v2861_v10 = vld [vmem:[%s2390_s8 + $0x58] sm:$0xff] }
 0x270   : > { %v1906_v15 = vpop.eup %1905  ;;  %v951_v42 = vadd.f32 1.0, %v1904_v14  ;;  %1831 = vset.pattern.permute.xlu1 %v2161_v40  ;;  %v2804_v6 = vpop.permute.xlu1 %1184 }
 0x271   : > { %v1908_v44 = vpop.eup %1907  ;;  %1068 = vperm.xlu1 %1831, %v1902_v54   ;;  %1088 = vperm.xlu0 %1830, %v1906_v15   ;;  %v2867_v15 = vld [vmem:[%s2398_s10 + $0x10] sm:$0xff] }
 0x272   : > { %v1910_v18 = vpop.eup %1909  ;;  %1921 = vrcp.f32 %v951_v42  ;;  %3344 = vst [vmem:[#allocation24_spill] sm:$0xff] %v2867_v15 }
 0x273   : > { %v1912_v19 = vpop.eup %1911  ;;  %v948_v63 = vadd.f32 1.0, %v1910_v18  ;;  %v2871_v18 = vld [vmem:[%s2390_s8 + $0x8] sm:$0xff] }
 0x274   : > { %v1914_v20 = vpop.eup %1913  ;;  %v944_v52 = vadd.f32 1.0, %v1912_v19  ;;  %3345 = vst [vmem:[#allocation25_spill] sm:$0xff] %v2871_v18 }
 0x275   : > { %1108 = vperm.xlu0 %1830, %v1914_v20   ;;  %1083 = vperm.xlu1 %1831, %v1908_v44   ;;  %v1916_v49 = vpop.eup %1915  ;;  %v2806_v53 = vpop.permute.xlu1 %1251 }
 0x276   : > { %1923 = vrcp.f32 %v944_v52 }
 0x277   : > { %1925 = vrcp.f32 %v948_v63 }
 0x278   : > { %v1918_v3 = vpop.eup %1917 }
 0x279   : > { %1073 = vperm.xlu0 %1830, %v1918_v3   ;;  %1103 = vperm.xlu1 %1831, %v1916_v49   ;;  %v1920_v58 = vpop.eup %1919  ;;  %v2882_v49 = vld [vmem:[%s2398_s10 + $0x18] sm:$0xff] }
 0x27a   : > { %v2808_v13 = vpop.permute.xlu1 %1279  ;;  %3346 = vst [vmem:[#allocation26_spill] sm:$0xff] %v2882_v49 }
 0x27c   : > { %v1922_v40 = vpop.eup %1921 }
 0x27d   : > { %1113 = vperm.xlu0 %1830, %v1922_v40   ;;  %1093 = vperm.xlu1 %1831, %v1920_v58   ;;  %v2886_v58 = vld [vmem:[%s2390_s8 + $0x20] sm:$0xff] }
 0x27e   : > { %v2810_v60 = vpop.permute.xlu1 %1283  ;;  %3347 = vst [vmem:[#allocation27_spill] sm:$0xff] %v2886_v58 }
 0x280   : > { %v1924_v21 = vpop.eup %1923 }
 0x281   : > { %1078 = vperm.xlu1 %1831, %v1924_v21   ;;  %v1926_v22 = vpop.eup %1925  ;;  %v2890_v21 = vld [vmem:[%s2398_s10 + $0x20] sm:$0xff] }
 0x282   : > { %3348 = vst [vmem:[#allocation28_spill] sm:$0xff] %v2890_v21 }
 0x283   : > { %v2812_v62 = vpop.permute.xlu1 %1188 }
 0x285   : > { %1098 = vperm.xlu1 %1831, %v1926_v22  }
 0x288   : > { %v2814_v41 = vpop.permute.xlu1 %1259 }
 0x289   : > { %1833 = vset.pattern.permute.xlu1 %v2159_v5 }
 0x28a   : > { %1291 = vperm.xlu1 %1833, %v2692_v0  }
 0x28d   : > { %v2816_v50 = vpop.permute.xlu1 %1164 }
 0x2bf   : > { %v892_v24 = vpop.xlane.xlu1 %891 }
 0x2c0   : > { %v904_v26 = vadd.f32 %v892_v24, %v2692_v0  ;;  %v2894_v24 = vld [vmem:[%s2398_s10 + $0x28] sm:$0xff] }
 0x2c1   : > { %3349 = vst [vmem:[#allocation29_spill] sm:$0xff] %v2894_v24 }
 0x2c2   : > { %v1712_v25 = vmul.f32 -1.442695, %v904_v26 }
 0x2c3   : > { %v2821_v29 = vpop.permute.xlu1 %1192 }
 0x2c4   : > { %1927 = vpow2.f32 %v1712_v25  ;;  %3339 = vst [vmem:[#allocation19_spill] sm:$0xff] %v2821_v29 }
 0x2c7   : > { %v985_v30 = vpop.permute.xlu1 %984 }
 0x2c8   : > { %v1038_v11 = vmul.f32 %v2853_v38, %v985_v30 }
 0x2ca   : > { %v1050_v19 = vadd.f32 %v2871_v18, %v1038_v11 }
 0x2cb   : > { %v990_v32 = vpop.permute.xlu1 %989 }
 0x2cc   : > { %v1039_v42 = vmul.f32 %v2867_v15, %v990_v32 }
 0x2ce   : > { %v1928_v27 = vpop.eup %1927 }
 0x2cf   : > { %v952_v48 = vadd.f32 1.0, %v1928_v27  ;;  %v995_v7 = vpop.permute.xlu1 %994  ;;  %v2899_v27 = vld [vmem:[%s2390_s8 + $0x10] sm:$0xff] }
 0x2d0   : > { %v1040_v3 = vmul.f32 %v2882_v49, %v995_v7  ;;  %3350 = vst [vmem:[#allocation30_spill] sm:$0xff] %v2899_v27  ;;  %v1051_v32 = vadd.f32 %v2899_v27, %v1039_v42  ;;  %v2908_v7 = vld [vmem:[%s2390_s8 + $0x28] sm:$0xff] }
 0x2d1   : > { %1929 = vrcp.f32 %v952_v48  ;;  %3352 = vst [vmem:[#allocation32_spill] sm:$0xff] %v2908_v7 }
 0x2d3   : > { %v1000_v33 = vpop.permute.xlu1 %999 }
 0x2d4   : > { %v1041_v22 = vmul.f32 %v2890_v21, %v1000_v33 }
 0x2d6   : > { %v1053_v42 = vadd.f32 %v2886_v58, %v1041_v22  ;;  %v2959_v22 = vmul.f32 %v2814_v41, %v1051_v32 }
 0x2d7   : > { %v1005_v47 = vpop.permute.xlu1 %1004 }
 0x2d8   : > { %v1042_v26 = vmul.f32 %v2894_v24, %v1005_v47 }
 0x2db   : > { %v1930_v28 = vpop.eup %1929  ;;  %v1010_v34 = vpop.permute.xlu1 %1009 }
 0x2dc   : > { %1118 = vperm.xlu0 %1830, %v1930_v28  }
 0x2df   : > { %v2824_v45 = vpop.permute.xlu1 %1019 }
 0x2e0   : > { %1832 = vset.pattern.permute.xlu0 %v2158_v4  ;;  %v2830_v4 = vpop.permute.xlu0 %1255 }
 0x2e1   : > { %1263 = vperm.xlu0 %1832, %v2692_v0  }
 0x2e3   : > { %v2828_v59 = vpop.permute.xlu1 %1024 }
 0x2e4   : > { %v2834_v36 = vpop.permute.xlu0 %1159 }
 0x2e5   : > { %1834 = vset.pattern.permute.xlu0 %v2159_v5 }
 0x2e7   : > { %v2832_v0 = vpop.permute.xlu1 %1029 }
 0x2e8   : > { %v2838_v35 = vpop.permute.xlu0 %1287 }
 0x2eb   : > { %v2836_v5 = vpop.permute.xlu1 %1014 }
 0x2ec   : > { %v980_v51 = vpop.permute.xlu0 %979 }
 0x2ed   : > { %v1037_v23 = vmul.f32 %v2843_v2, %v980_v51  ;;  %v1168_v51 = vmul.f32 %v2802_v16, %v1050_v19 }
 0x2ef   : > { %v1049_v54 = vadd.f32 %v2857_v12, %v1037_v23  ;;  %v2924_v23 = vld [vmem:[%s2390_s8 + $0x18] sm:$0xff] }
 0x2f0   : > { %v1069_v37 = vpop.permute.xlu1 %1068  ;;  %v1035_v57 = vpop.permute.xlu0 %1034  ;;  %3355 = vst [vmem:[#allocation35_spill] sm:$0xff] %v2924_v23  ;;  %v2931_v11 = vadd.f32 %v2924_v23, %v1040_v3  ;;  %v2948_v3 = vld [vmem:[%s2398_s10 + $0x38] sm:$0xff] }
 0x2f1   : > { %v1048_v8 = vmul.f32 %v2849_v55, %v1035_v57  ;;  %v1122_v20 = vmul.f32 %v2871_v18, %v1069_v37  ;;  %v2876_v52 = vmul.f32 %v2800_v31, %v1049_v54  ;;  %v2879_v63 = vmul.f32 %v2806_v53, %v1049_v54  ;;  %v2912_v37 = vld [vmem:[%s2390_s8 + $0x30] sm:$0xff]  ;;  %v2937_v54 = vld [vmem:[%s2390_s8 + $0x38] sm:$0xff]  ;;  %3358 = vst [vmem:[#allocation38_spill] sm:$0xff] %v2948_v3 }
 0x2f2   : > { %3353 = vst [vmem:[#allocation33_spill] sm:$0xff] %v2912_v37  ;;  %3356 = vst [vmem:[#allocation36_spill] sm:$0xff] %v2931_v11 }
 0x2f3   : > { %v2864_v14 = vadd.f32 %v2861_v10, %v1048_v8  ;;  %3357 = vst [vmem:[#allocation37_spill] sm:$0xff] %v2937_v54 }
 0x2f4   : > { %v1084_v46 = vpop.permute.xlu1 %1083  ;;  %v1064_v17 = vpop.permute.xlu0 %1063 }
 0x2f5   : > { %3343 = vst [vmem:[#allocation23_spill] sm:$0xff] %v2864_v14  ;;  %v1125_v40 = vmul.f32 %v2886_v58, %v1084_v46  ;;  %v1121_v25 = vmul.f32 %v2857_v12, %v1064_v17  ;;  %v2904_v30 = vmul.f32 %v2816_v50, %v2864_v14  ;;  %v2917_v46 = vld [vmem:[%s2398_s10 + $0x30] sm:$0xff]  ;;  %v2921_v17 = vadd.f32 %v2853_v38, %v1122_v20 }
 0x2f6   : > { %3354 = vst [vmem:[#allocation34_spill] sm:$0xff] %v2917_v46  ;;  %v1043_v57 = vmul.f32 %v2917_v46, %v1010_v34  ;;  %v1169_v20 = vmul.f32 %v2834_v36, %v1051_v32  ;;  %v3022_v14 = vld [vmem:[%s2390_s8 + $0x50] sm:$0xff] }
 0x2f7   : > { %3351 = vst [vmem:[#allocation31_spill] sm:$0xff] %v2904_v30  ;;  %v3016_v30 = vld [vmem:[%s2398_s10 + $0x50] sm:$0xff] }
 0x2f8   : > { %v2840_v9 = vpop.permute.xlu1 %1103  ;;  %v1089_v56 = vpop.permute.xlu0 %1088 }
 0x2f9   : > { %v1126_v33 = vmul.f32 %v2908_v7, %v1089_v56  ;;  %v2928_v56 = vmul.f32 %v2830_v4, %v1050_v19 }
 0x2fc   : > { %v1094_v61 = vpop.permute.xlu1 %1093  ;;  %v2846_v43 = vpop.permute.xlu0 %1108 }
 0x2fd   : > { %v1127_v47 = vmul.f32 %v2912_v37, %v1094_v61  ;;  %v2934_v61 = vadd.f32 %v2890_v21, %v1125_v40  ;;  %v1044_v40 = vmul.f32 %v2948_v3, %v2836_v5  ;;  %v2953_v21 = vadd.f32 %v2894_v24, %v1126_v33  ;;  %v2972_v33 = vld [vmem:[%s2398_s10 + $0x40] sm:$0xff] }
 0x2fe   : > { %v1170_v5 = vmul.f32 %v2816_v50, %v2931_v11  ;;  %v2992_v24 = vld [vmem:[%s2390_s8 + $0x40] sm:$0xff]  ;;  %v1270_v11 = vmul.f32 %v2806_v53, %v1053_v42 }
 0x2ff   : > { %v1199_v32 = vmul.f32 %v2826_v1, %v2934_v61  ;;  %3360 = vst [vmem:[#allocation40_spill] sm:$0xff] %v2992_v24 }
 0x300   : > { %v1079_v39 = vpop.permute.xlu1 %1078  ;;  %v1074_v44 = vpop.permute.xlu0 %1073 }
 0x301   : > { %v1123_v48 = vmul.f32 %v2899_v27, %v1074_v44  ;;  %v1124_v8 = vmul.f32 %v2924_v23, %v1079_v39  ;;  %v1054_v44 = vadd.f32 %v2908_v7, %v1042_v26  ;;  %v1133_v39 = vadd.f32 %v2843_v2, %v1121_v25  ;;  %v3001_v27 = vld [vmem:[%s2398_s10 + $0x48] sm:$0xff]  ;;  %s1713_s10 = sld [smem:[#allocation8 + $0x1]] }
 0x302   : > { %v2962_v26 = vadd.f32 %v2912_v37, %v1043_v57  ;;  %v1196_v25 = vmul.f32 %v2804_v6, %v2921_v17  ;;  %v1171_v37 = vmul.f32 %v2800_v31, %v1053_v42  ;;  %v2987_v7 = vadd.f32 %v2937_v54, %v1044_v40  ;;  %v3009_v2 = vld [vmem:[%s2390_s8 + $0x48] sm:$0xff]  ;;  %s1145_s8 = sld [smem:[#allocation8]] }
 0x303   : > { %v2944_v19 = vadd.f32 %v2867_v15, %v1123_v48  ;;  %v2967_v48 = vadd.f32 %v2882_v49, %v1124_v8  ;;  %v1172_v8 = vmul.f32 %v2802_v16, %v1054_v44  ;;  %v1046_v40 = vmul.f32 %v3001_v27, %v2828_v59 }
 0x304   : > { %v1099_v28 = vpop.permute.xlu1 %1098  ;;  %v1114_v23 = vpop.permute.xlu0 %1113  ;;  %v1173_v49 = vmul.f32 %v2834_v36, %v2962_v26  ;;  %v1130_v18 = vmul.f32 %v3009_v2, %v2846_v43  ;;  %v1047_v59 = vmul.f32 %v3016_v30, %v2832_v0  ;;  %v1295_v42 = vmul.f32 %v2810_v60, %v2921_v17 }
 0x305   : > { %v1128_v34 = vmul.f32 %v2937_v54, %v1099_v28  ;;  %v2956_v28 = vadd.f32 %v2917_v46, %v1127_v47  ;;  %v1045_v47 = vmul.f32 %v2972_v33, %v2824_v45  ;;  %v1195_v46 = vmul.f32 %v2826_v1, %v1133_v39 }
 0x306   : > { %v1197_v58 = vmul.f32 %v2812_v62, %v2944_v19  ;;  %v1200_v45 = vmul.f32 %v2804_v6, %v2953_v21  ;;  %v1208_v54 = vadd.f32 %v1196_v25, %v1168_v51  ;;  %v1198_v15 = vmul.f32 %v2821_v29, %v2967_v48 }
 0x307   : > { %v2979_v57 = vadd.f32 %v2948_v3, %v1128_v34  ;;  %v1129_v34 = vmul.f32 %v2992_v24, %v2840_v9  ;;  %v1201_v3 = vmul.f32 %v2812_v62, %v2956_v28  ;;  %v1057_v12 = vadd.f32 %v2992_v24, %v1045_v47 }
 0x308   : > { %v1211_v9 = vadd.f32 %v1199_v32, %v1171_v37  ;;  %v1207_v51 = vadd.f32 %v1195_v46, %v2876_v52  ;;  %v1209_v25 = vadd.f32 %v1197_v58, %v1169_v20  ;;  %v1131_v37 = vmul.f32 %v3022_v14, %v1114_v23 }
 0x309   : > { %3359 = vst [vmem:[#allocation39_spill] sm:$0xff] %v2979_v57  ;;  %v1202_v38 = vmul.f32 %v2821_v29, %v2979_v57  ;;  %v1174_v47 = vmul.f32 %v2816_v50, %v2987_v7  ;;  %v1212_v32 = vadd.f32 %v1200_v45, %v1172_v8  ;;  %v1141_v43 = vadd.f32 %v2972_v33, %v1129_v34 }
 0x30a   : > { %v1213_v24 = vadd.f32 %v1201_v3, %v1173_v49  ;;  %v1058_v57 = vadd.f32 %v3009_v2, %v1046_v40  ;;  %v1219_v29 = vadd.f32 %v1208_v54, %v1207_v51  ;;  %v1210_v0 = vadd.f32 %v1198_v15, %v1170_v5 }
 0x30b   : > { %v1271_v52 = vmul.f32 %v2830_v4, %v1054_v44  ;;  %v1228_v58 = vadd.f32 %v1212_v32, %v1211_v9  ;;  %v1142_v46 = vadd.f32 %v3001_v27, %v1130_v18  ;;  %v1214_v20 = vadd.f32 %v1202_v38, %v1174_v47 }
 0x30c   : > { %v1059_v23 = vadd.f32 %v3022_v14, %v1047_v59  ;;  %v1294_v50 = vmul.f32 %v2808_v13, %v1133_v39  ;;  %v1220_v8 = vadd.f32 %v1219_v29, %v1209_v25  ;;  %v1143_v45 = vadd.f32 %v3016_v30, %v1131_v37 }
 0x30d   : > { %v1175_v49 = vmul.f32 %v2800_v31, %v1057_v12  ;;  %v1203_v15 = vmul.f32 %v2826_v1, %v1141_v43  ;;  %v1229_v54 = vadd.f32 %v1228_v58, %v1213_v24  ;;  %v1274_v44 = vmul.f32 %v2806_v53, %v1057_v12 }
 0x30e   : > { %v1176_v18 = vmul.f32 %v2802_v16, %v1058_v57  ;;  %v1298_v38 = vmul.f32 %v2808_v13, %v2934_v61  ;;  %v1221_v3 = vadd.f32 %v1220_v8, %v1210_v0  ;;  %v1204_v29 = vmul.f32 %v2804_v6, %v1142_v46 }
 0x30f   : > { %v1302_v39 = vmul.f32 %v2808_v13, %v1141_v43  ;;  %v1296_v31 = vmul.f32 %v2838_v35, %v2944_v19  ;;  %v1230_v5 = vadd.f32 %v1229_v54, %v1214_v20  ;;  %v1275_v17 = vmul.f32 %v2830_v4, %v1058_v57 }
 0x310   : > { %v1177_v1 = vmul.f32 %v2834_v36, %v1059_v23  ;;  %v1306_v53 = vadd.f32 %v1294_v50, %v2879_v63  ;;  %v1205_v16 = vmul.f32 %v2812_v62, %v1143_v45  ;;  %v1307_v12 = vadd.f32 %v1295_v42, %v2928_v56 }
 0x311   : > { %v1299_v24 = vmul.f32 %v2810_v60, %v2953_v21  ;;  %v1303_v6 = vmul.f32 %v2810_v60, %v1142_v46  ;;  %v1215_v13 = vadd.f32 %v1203_v15, %v1175_v49  ;;  %v1310_v61 = vadd.f32 %v1298_v38, %v1270_v11  ;;  %v3361_v46 = vld [vmem:[#allocation19_spill] sm:$0xff] }
 0x312   : > { %v1300_v19 = vmul.f32 %v2838_v35, %v2956_v28  ;;  %v1304_v4 = vmul.f32 %v2838_v35, %v1143_v45  ;;  %v1222_v57 = vrot.slane %v1221_v3, 4  ;;  %v1216_v36 = vadd.f32 %v1204_v29, %v1176_v18  ;;  %v1292_v35 = vpop.permute.xlu1 %1291  ;;  %v3363_v45 = vld [vmem:[#allocation36_spill] sm:$0xff]  ;;  %v3364_v15 = vld [vmem:[#allocation23_spill] sm:$0xff] }
 0x313   : > { %v1314_v34 = vadd.f32 %v1302_v39, %v1274_v44  ;;  %v1308_v63 = vadd.f32 %v1296_v31, %v2959_v22  ;;  %v1231_v62 = vrot.slane %v1230_v5, 4  ;;  %v1272_v56 = vmul.f32 %v2814_v41, %v2962_v26  ;;  %v3365_v18 = vld [vmem:[#allocation31_spill] sm:$0xff] }
 0x314   : > { %v1276_v21 = vmul.f32 %v2814_v41, %v1059_v23  ;;  %v1217_v60 = vadd.f32 %v1205_v16, %v1177_v1  ;;  %v1318_v9 = vadd.f32 %v1307_v12, %v1306_v53  ;;  %v1311_v59 = vadd.f32 %v1299_v24, %v1271_v52  ;;  %v3362_v52 = vld [vmem:[#allocation39_spill] sm:$0xff] }
 0x315   : > { %v1315_v28 = vadd.f32 %v1303_v6, %v1275_v17  ;;  %v1237_v51 = vadd.f32 %v1216_v36, %v1215_v13  ;;  %v1312_v25 = vadd.f32 %v1300_v19, %v1272_v56  ;;  %v1223_v47 = vadd.f32 %v1222_v57, %v1221_v3 }
 0x316   : > { %v1316_v37 = vadd.f32 %v1304_v4, %v1276_v21  ;;  %v1327_v32 = vadd.f32 %v1311_v59, %v1310_v61  ;;  %v1232_v0 = vadd.f32 %v1231_v62, %v1230_v5  ;;  %v1319_v58 = vadd.f32 %v1318_v9, %v1308_v63 }
 0x317   : > { %v1336_v43 = vadd.f32 %v1315_v28, %v1314_v34  ;;  %v1238_v26 = vadd.f32 %v1237_v51, %v1217_v60  ;;  %v1297_v41 = vmul.f32 %v1292_v35, %v2967_v48  ;;  %v1301_v8 = vmul.f32 %v1292_v35, %v3362_v52 }
 0x318   : > { %v1224_v44 = vrot.slane %v1223_v47, 2  ;;  %v1328_v3 = vadd.f32 %v1327_v32, %v1312_v25  ;;  %v1233_v39 = vrot.slane %v1232_v0, 2  ;;  %v1246_v28 = vstv %s1145_s8 }
 0x319   : > { %v1337_v29 = vadd.f32 %v1336_v43, %v1316_v37  ;;  %v1345_v43 = vstv %s1713_s10 }
 0x31a   : > { %v1225_v12 = vadd.f32 %v1224_v44, %v1223_v47  ;;  %v1234_v6 = vadd.f32 %v1233_v39, %v1232_v0 }
 0x31c   : > { %v1226_v34 = vrot.slane %v1225_v12, 1  ;;  %v1235_v62 = vrot.slane %v1234_v6, 1 }
 0x31e   : > { %v1227_v51 = vadd.f32 %v1226_v34, %v1225_v12  ;;  %v1236_v25 = vadd.f32 %v1235_v62, %v1234_v6  ;;  %v3371_v12 = vld [vmem:[#allocation30_spill] sm:$0xff]  ;;  %v3379_v62 = vld [vmem:[#allocation33_spill] sm:$0xff] }
 0x31f   : > { %v3372_v6 = vld [vmem:[#allocation26_spill] sm:$0xff] }
 0x35b   : > { %v1119_v40 = vpop.permute.xlu0 %1118 }
 0x35c   : > { %v1132_v11 = vmul.f32 %v2861_v10, %v1119_v40 }
 0x35e   : > { %v1144_v22 = vadd.f32 %v2849_v55, %v1132_v11 }
 0x360   : > { %v1206_v20 = vmul.f32 %v3361_v46, %v1144_v22  ;;  %v1305_v23 = vmul.f32 %v1292_v35, %v1144_v22  ;;  %v1264_v50 = vpop.permute.xlu0 %1263 }
 0x361   : > { %v1269_v49 = vmul.f32 %v1264_v50, %v3363_v45  ;;  %v1273_v42 = vmul.f32 %v1264_v50, %v2987_v7  ;;  %v1277_v54 = vmul.f32 %v1264_v50, %v3364_v15 }
 0x362   : > { %v1218_v38 = vadd.f32 %v1206_v20, %v3365_v18  ;;  %v1248_v20 = vadd.f32 %v1246_v28, %v1236_v25 }
 0x363   : > { %v1309_v31 = vadd.f32 %v1297_v41, %v1269_v49  ;;  %v1313_v48 = vadd.f32 %v1301_v8, %v1273_v42  ;;  %v1317_v5 = vadd.f32 %v1305_v23, %v1277_v54  ;;  %v1247_v41 = vadd.f32 %v1246_v28, %v1227_v51 }
 0x364   : > { %v1239_v17 = vadd.f32 %v1238_v26, %v1218_v38  ;;  %v1381_v51 = vsub.f32 %v2861_v10, %v2849_v55 }
 0x365   : > { %v1320_v1 = vadd.f32 %v1319_v58, %v1309_v31  ;;  %v1329_v53 = vadd.f32 %v1328_v3, %v1313_v48  ;;  %v1338_v16 = vadd.f32 %v1337_v29, %v1317_v5  ;;  %v3366_v31 = vld [vmem:[#allocation21_spill] sm:$0xff] }
 0x366   : > { %v1240_v24 = vrot.slane %v1239_v17, 4  ;;  %v3367_v48 = vld [vmem:[#allocation25_spill] sm:$0xff] }
 0x367   : > { %v1321_v7 = vrot.slane %v1320_v1, 4  ;;  %v1330_v13 = vrot.slane %v1329_v53, 4  ;;  %v1339_v61 = vrot.slane %v1338_v16, 4  ;;  %v1371_v5 = vsub.f32 %v3367_v48, %v3366_v31 }
 0x368   : > { %v1241_v19 = vadd.f32 %v1240_v24, %v1239_v17  ;;  %v3368_v17 = vld [vmem:[#allocation20_spill] sm:$0xff] }
 0x369   : > { %v1322_v4 = vadd.f32 %v1321_v7, %v1320_v1  ;;  %v1331_v57 = vadd.f32 %v1330_v13, %v1329_v53  ;;  %v1340_v36 = vadd.f32 %v1339_v61, %v1338_v16  ;;  %v3369_v1 = vld [vmem:[#allocation22_spill] sm:$0xff]  ;;  %v3370_v16 = vld [vmem:[#allocation24_spill] sm:$0xff]  ;;  %v3373_v7 = vld [vmem:[#allocation35_spill] sm:$0xff] }
 0x36a   : > { %v1242_v63 = vrot.slane %v1241_v19, 2  ;;  %v1370_v53 = vsub.f32 %v3369_v1, %v3368_v17  ;;  %v1372_v24 = vsub.f32 %v3371_v12, %v3370_v16  ;;  %v1373_v13 = vsub.f32 %v3373_v7, %v3372_v6  ;;  %v3374_v61 = vld [vmem:[#allocation29_spill] sm:$0xff] }
 0x36b   : > { %v1323_v40 = vrot.slane %v1322_v4, 2  ;;  %v1332_v56 = vrot.slane %v1331_v57, 2  ;;  %v1341_v21 = vrot.slane %v1340_v36, 2 }
 0x36c   : > { %v1243_v60 = vadd.f32 %v1242_v63, %v1241_v19  ;;  %v3375_v19 = vld [vmem:[#allocation32_spill] sm:$0xff]  ;;  %v3378_v63 = vld [vmem:[#allocation34_spill] sm:$0xff] }
 0x36d   : > { %v1324_v11 = vadd.f32 %v1323_v40, %v1322_v4  ;;  %v1333_v9 = vadd.f32 %v1332_v56, %v1331_v57  ;;  %v1342_v59 = vadd.f32 %v1341_v21, %v1340_v36  ;;  %v1375_v4 = vsub.f32 %v3375_v19, %v3374_v61  ;;  %v3376_v57 = vld [vmem:[#allocation28_spill] sm:$0xff]  ;;  %v3377_v36 = vld [vmem:[#allocation27_spill] sm:$0xff]  ;;  %v3380_v56 = vld [vmem:[#allocation38_spill] sm:$0xff] }
 0x36e   : > { %v1244_v35 = vrot.slane %v1243_v60, 1  ;;  %v1374_v34 = vsub.f32 %v3377_v36, %v3376_v57  ;;  %v1376_v40 = vsub.f32 %v3379_v62, %v3378_v63  ;;  %v3381_v21 = vld [vmem:[#allocation37_spill] sm:$0xff] }
 0x36f   : > { %v1325_v37 = vrot.slane %v1324_v11, 1  ;;  %v1334_v47 = vrot.slane %v1333_v9, 1  ;;  %v1343_v22 = vrot.slane %v1342_v59, 1 }
 0x370   : > { %v1245_v32 = vadd.f32 %v1244_v35, %v1243_v60  ;;  %v1377_v60 = vsub.f32 %v3381_v21, %v3380_v56 }
 0x371   : > { %v1326_v0 = vadd.f32 %v1325_v37, %v1324_v11  ;;  %v1335_v58 = vadd.f32 %v1334_v47, %v1333_v9  ;;  %v1344_v26 = vadd.f32 %v1343_v22, %v1342_v59  ;;  %v1379_v11 = vsub.f32 %v3009_v2, %v3001_v27  ;;  %v3382_v9 = vld [vmem:[#allocation40_spill] sm:$0xff] }
 0x372   : > { %v1249_v46 = vadd.f32 %v1246_v28, %v1245_v32  ;;  %v1378_v59 = vsub.f32 %v3382_v9, %v2972_v33  ;;  %v1380_v28 = vsub.f32 %v3022_v14, %v3016_v30 }
 0x373   : > { %v1346_v23 = vadd.f32 %v1345_v43, %v1326_v0  ;;  %v1347_v50 = vadd.f32 %v1345_v43, %v1335_v58  ;;  %v1348_v52 = vadd.f32 %v1345_v43, %v1344_v26 }
 0x375   : > { %v1349_v8 = vsub.f32 %v1247_v41, %v1346_v23  ;;  %v1350_v45 = vsub.f32 %v1248_v20, %v1347_v50  ;;  %v1351_v49 = vsub.f32 %v1249_v46, %v1348_v52 }
 0x377   : > { %v1714_v42 = vmul.f32 -1.442695, %v1349_v8  ;;  %v1715_v15 = vmul.f32 -1.442695, %v1350_v45  ;;  %v1716_v54 = vmul.f32 -1.442695, %v1351_v49 }
 0x379   : > { %1931 = vpow2.f32 %v1714_v42 }
 0x37a   : > { %1933 = vpow2.f32 %v1715_v15 }
 0x37b   : > { %1935 = vpow2.f32 %v1716_v54 }
 0x383   : > { %v1932_v44 = vpop.eup %1931 }
 0x384   : > { %v1934_v18 = vpop.eup %1933  ;;  %v1361_v38 = vadd.f32 1.0, %v1932_v44 }
 0x385   : > { %v1936_v3 = vpop.eup %1935  ;;  %v1362_v29 = vadd.f32 1.0, %v1934_v18 }
 0x386   : > { %v1363_v39 = vadd.f32 1.0, %v1936_v3  ;;  %1937 = vrcp.f32 %v1361_v38 }
 0x387   : > { %1939 = vrcp.f32 %v1362_v29 }
 0x388   : > { %1941 = vrcp.f32 %v1363_v39 }
 0x390   : > { %v1938_v35 = vpop.eup %1937 }
 0x391   : > { %v1940_v25 = vpop.eup %1939  ;;  %v1382_v37 = vmul.f32 %v1938_v35, %v1370_v53  ;;  %v1383_v47 = vmul.f32 %v1938_v35, %v1371_v5  ;;  %v1384_v22 = vmul.f32 %v1938_v35, %v1372_v24  ;;  %v1385_v32 = vmul.f32 %v1938_v35, %v1373_v13 }
 0x392   : > { %v1942_v43 = vpop.eup %1941  ;;  %v1386_v0 = vmul.f32 %v1940_v25, %v1374_v34  ;;  %v1387_v58 = vmul.f32 %v1940_v25, %v1375_v4  ;;  %v1388_v26 = vmul.f32 %v1940_v25, %v1376_v40  ;;  %v1389_v41 = vmul.f32 %v1940_v25, %v1377_v60 }
 0x393   : > { %v1390_v46 = vmul.f32 %v1942_v43, %v1378_v59  ;;  %v1391_v20 = vmul.f32 %v1942_v43, %v1379_v11  ;;  %v1392_v23 = vmul.f32 %v1942_v43, %v1380_v28  ;;  %v1393_v50 = vmul.f32 %v1942_v43, %v1381_v51 }
 0x394   : > { %v1394_v52 = vadd.f32 %v3368_v17, %v1382_v37  ;;  %v1395_v8 = vadd.f32 %v3366_v31, %v1383_v47  ;;  %v1396_v45 = vadd.f32 %v3370_v16, %v1384_v22  ;;  %v1397_v49 = vadd.f32 %v3372_v6, %v1385_v32 }
 0x395   : > { %v3100_v42 = vadd.f32 %v3376_v57, %v1386_v0  ;;  %v3103_v15 = vadd.f32 %v3374_v61, %v1387_v58  ;;  %v3106_v54 = vadd.f32 %v3378_v63, %v1388_v26  ;;  %v3109_v44 = vadd.f32 %v3380_v56, %v1389_v41 }
 0x396   : > { %v3112_v18 = vadd.f32 %v2972_v33, %v1390_v46  ;;  %v3115_v38 = vadd.f32 %v3001_v27, %v1391_v20  ;;  %v3118_v3 = vadd.f32 %v3016_v30, %v1392_v23  ;;  %v3121_v29 = vadd.f32 %v2849_v55, %v1393_v50 }
 0x397   : > { %v1406_v39 = vadd.f32 %v3369_v1, %v1394_v52  ;;  %v1407_v5 = vadd.f32 %v3367_v48, %v1395_v8  ;;  %v1408_v53 = vadd.f32 %v3371_v12, %v1396_v45  ;;  %v1409_v24 = vadd.f32 %v3373_v7, %v1397_v49 }
 0x398   : > { %v1410_v13 = vadd.f32 %v3377_v36, %v3100_v42  ;;  %v1411_v4 = vadd.f32 %v3375_v19, %v3103_v15  ;;  %v1412_v34 = vadd.f32 %v3379_v62, %v3106_v54  ;;  %v1413_v1 = vadd.f32 %v3381_v21, %v3109_v44 }
 0x399   : > { %v1414_v48 = vadd.f32 %v3382_v9, %v3112_v18  ;;  %v1415_v12 = vadd.f32 %v3009_v2, %v3115_v38  ;;  %v1416_v7 = vadd.f32 %v3022_v14, %v3118_v3  ;;  %v1417_v36 = vadd.f32 %v2861_v10, %v3121_v29 }
 0x39a   : > { %v1418_v19 = vmax.f32 %v1406_v39, 0.0  ;;  %v1419_v40 = vmax.f32 %v1407_v5, 0.0  ;;  %v1420_v60 = vmax.f32 %v1408_v53, 0.0  ;;  %v1421_v11 = vmax.f32 %v1409_v24, 0.0 }
 0x39b   : > { %v1422_v62 = vmax.f32 %v1410_v13, 0.0  ;;  %v1423_v59 = vmax.f32 %v1411_v4, 0.0  ;;  %v1424_v21 = vmax.f32 %v1412_v34, 0.0  ;;  %v1425_v28 = vmax.f32 %v1413_v1, 0.0 }
 0x39c   : > { %v1426_v2 = vmax.f32 %v1414_v48, 0.0  ;;  %v1427_v9 = vmax.f32 %v1415_v12, 0.0  ;;  %v1428_v14 = vmax.f32 %v1416_v7, 0.0  ;;  %v1429_v51 = vmax.f32 %v1417_v36, 0.0 }
 0x39d   : > { %v1430_v10 = vmul.f32 0.5, %v1418_v19  ;;  %v1431_v35 = vmul.f32 0.5, %v1419_v40  ;;  %v1432_v25 = vmul.f32 0.5, %v1420_v60  ;;  %v1433_v37 = vmul.f32 0.5, %v1421_v11 }
 0x39e   : > { %v1434_v47 = vmul.f32 0.5, %v1422_v62  ;;  %v1435_v22 = vmul.f32 0.5, %v1423_v59  ;;  %v1436_v32 = vmul.f32 0.5, %v1424_v21  ;;  %v1437_v43 = vmul.f32 0.5, %v1425_v28 }
 0x39f   : > { %v1438_v0 = vmul.f32 0.5, %v1426_v2  ;;  %v1439_v58 = vmul.f32 0.5, %v1427_v9  ;;  %v1440_v26 = vmul.f32 0.5, %v1428_v14  ;;  %v1441_v41 = vmul.f32 0.5, %v1429_v51  ;;  %1442 = vst [vmem:[%s3145_s12] sm:$0xff] %v1430_v10  ;;  %1443 = vst [vmem:[%s3145_s12 + $0x8] sm:$0xff] %v1431_v35 }
 0x3a0   : > { %1444 = vst [vmem:[%s3145_s12 + $0x10] sm:$0xff] %v1432_v25  ;;  %1445 = vst [vmem:[%s3145_s12 + $0x18] sm:$0xff] %v1433_v37  ;;  %v1454_v46 = vadd.f32 %v3368_v17, %v1394_v52  ;;  %v1455_v20 = vadd.f32 %v3366_v31, %v1395_v8  ;;  %v1456_v23 = vadd.f32 %v3370_v16, %v1396_v45 }
 0x3a1   : > { %1446 = vst [vmem:[%s3145_s12 + $0x20] sm:$0xff] %v1434_v47  ;;  %1447 = vst [vmem:[%s3145_s12 + $0x28] sm:$0xff] %v1435_v22  ;;  %v1457_v50 = vadd.f32 %v3372_v6, %v1397_v49  ;;  %v1458_v39 = vadd.f32 %v3376_v57, %v3100_v42  ;;  %v1459_v17 = vadd.f32 %v3374_v61, %v3103_v15 }
 0x3a2   : > { %1448 = vst [vmem:[%s3145_s12 + $0x30] sm:$0xff] %v1436_v32  ;;  %1449 = vst [vmem:[%s3145_s12 + $0x38] sm:$0xff] %v1437_v43  ;;  %v1460_v31 = vadd.f32 %v3378_v63, %v3106_v54  ;;  %v1461_v16 = vadd.f32 %v3380_v56, %v3109_v44  ;;  %v1462_v6 = vadd.f32 %v2972_v33, %v3112_v18 }
 0x3a3   : > { %1450 = vst [vmem:[%s3145_s12 + $0x40] sm:$0xff] %v1438_v0  ;;  %1451 = vst [vmem:[%s3145_s12 + $0x48] sm:$0xff] %v1439_v58  ;;  %v1463_v52 = vadd.f32 %v3001_v27, %v3115_v38  ;;  %v1464_v8 = vadd.f32 %v3016_v30, %v3118_v3  ;;  %v1465_v57 = vadd.f32 %v2849_v55, %v3121_v29 }
 0x3a4   : > { %1452 = vst [vmem:[%s3145_s12 + $0x50] sm:$0xff] %v1440_v26  ;;  %1453 = vst [vmem:[%s3145_s12 + $0x58] sm:$0xff] %v1441_v41 }
 0x3a5   : > { %2055 = shalt.err (!%p2052_p12)
}
 0x3a6   : > { %s2056_s16 = scalar_lea.hbm %s3153_s9, 1536  ;;  %s2060_s8 = scalar_lea.hbm %s3277_s6, 3072 }
 0x3a7   : > { %p2057_p9 = scmp.ne.s32.totalorder %s3153_s9, %s2056_s16  ;;  %p2061_p5 = scmp.lt.u32.totalorder %s3153_s9, %s3277_s6 }
 0x3a8   : > { %p2062_p13 = scmp.lt.u32.totalorder %s2060_s8, %s2056_s16  ;;  %p2064_p8 = scmp.lt.u32.totalorder %s2056_s16, %s3153_s9 }
 0x3a9   : > { %p2058_p10 = pnand %p2057_p9, %p3383_p4 }
 0x3aa   : > { %p2063_p3 = por %p2062_p13, %p2061_p5 }
 0x3ab   : > { %p2059_p1 = pneg %p2058_p10 }
 0x3ac   : > { %p2065_p11 = por %p2064_p8, %p2063_p3 }
 0x3ae   : > { %p2066_p0 = pnand %p2065_p11, %p2059_p1 }
 0x3b0   : > { %2069 = shalt.err (!%p2066_p0)
}
 0x3b1   : > { %s2163_s20 = smov 128   ;;  %s2164_s5 = smov 8   ;;  %v1466_v55 = vmax.f32 %v1454_v46, 0.0  ;;  %v1467_v27 = vmax.f32 %v1455_v20, 0.0  ;;  %v1468_v30 = vmax.f32 %v1456_v23, 0.0  ;;  %v1469_v33 = vmax.f32 %v1457_v50, 0.0 }
 0x3b2   : > { %1746 = dma.vmem_to_hbm [thread:$0]  (%p3383_p4), %s3155_s15, 1536, %s3153_s9, %s1503_s18, %s2163_s20, %s2163_s20, %s2164_s5   ;;  %v1470_v61 = vmax.f32 %v1458_v39, 0.0  ;;  %v1471_v63 = vmax.f32 %v1459_v17, 0.0  ;;  %v1472_v56 = vmax.f32 %v1460_v31, 0.0  ;;  %v1473_v45 = vmax.f32 %v1461_v16, 0.0 }
 0x3b3   : > { %v1474_v49 = vmax.f32 %v1462_v6, 0.0  ;;  %v1475_v42 = vmax.f32 %v1463_v52, 0.0  ;;  %v1476_v15 = vmax.f32 %v1464_v8, 0.0  ;;  %v1477_v54 = vmax.f32 %v1465_v57, 0.0  ;;  %s363_s19 = scalar_lea.vmem [#allocation10], %s2386_s23  ;;  %s3222_s9 = scalar_lea.hbm %s3278_s7, %s1733_s0 }
 0x3b4   : > { %s1539_s22 = sshll.u32 %s363_s19, 4  ;;  %v1478_v44 = vmul.f32 0.5, %v1466_v55  ;;  %v1479_v18 = vmul.f32 0.5, %v1467_v27  ;;  %v1480_v38 = vmul.f32 0.5, %v1468_v30  ;;  %v1481_v3 = vmul.f32 0.5, %v1469_v33  ;;  %s1508_s18 = scalar_lea.sflag [#allocation11], %s2383_s26  ;;  %s3224_s22 = int_to_ptr.vmem [resolvable:$true] %s1539_s22 }
 0x3b5   : > { %v1482_v29 = vmul.f32 0.5, %v1470_v61  ;;  %v1483_v5 = vmul.f32 0.5, %v1471_v63  ;;  %v1484_v53 = vmul.f32 0.5, %v1472_v56  ;;  %v1485_v24 = vmul.f32 0.5, %v1473_v45  ;;  %s2070_s28 = scalar_lea.vmem %s3224_s22, 1536  ;;  %s2165_s0 = smov [#allocation10]  }
 0x3b6   : > { %v1486_v13 = vmul.f32 0.5, %v1474_v49  ;;  %v1487_v4 = vmul.f32 0.5, %v1475_v42  ;;  %v1488_v34 = vmul.f32 0.5, %v1476_v15  ;;  %v1489_v1 = vmul.f32 0.5, %v1477_v54  ;;  %1490 = vst [vmem:[%s363_s19] sm:$0xff] %v1478_v44  ;;  %1491 = vst [vmem:[%s363_s19 + $0x8] sm:$0xff] %v1479_v18  ;;  %p2071_p2 = scmp.ne.s32.totalorder %s3224_s22, %s2070_s28  ;;  %s2074_s17 = sshll.u32 %s2165_s0, 4  ;;  %s2075_s17 = int_to_ptr.vmem [resolvable:$false] %s2074_s17 }
 0x3b7   : > { %1492 = vst [vmem:[%s363_s19 + $0x10] sm:$0xff] %v1480_v38  ;;  %1493 = vst [vmem:[%s363_s19 + $0x18] sm:$0xff] %v1481_v3  ;;  %s2076_s29 = scalar_lea.vmem %s2075_s17, 3072  ;;  %p2077_p12 = scmp.lt.s32.totalorder %s3224_s22, %s2075_s17 }
 0x3b8   : > { %1494 = vst [vmem:[%s363_s19 + $0x20] sm:$0xff] %v1482_v29  ;;  %1495 = vst [vmem:[%s363_s19 + $0x28] sm:$0xff] %v1483_v5  ;;  %p2072_p7 = pnand %p2071_p2, %p3383_p4  ;;  %p2078_p9 = scmp.lt.s32.totalorder %s2076_s29, %s2070_s28 }
 0x3b9   : > { %1496 = vst [vmem:[%s363_s19 + $0x30] sm:$0xff] %v1484_v53  ;;  %1497 = vst [vmem:[%s363_s19 + $0x38] sm:$0xff] %v1485_v24 }
 0x3ba   : > { %1498 = vst [vmem:[%s363_s19 + $0x40] sm:$0xff] %v1486_v13  ;;  %1499 = vst [vmem:[%s363_s19 + $0x48] sm:$0xff] %v1487_v4  ;;  %p2073_p6 = pneg %p2072_p7  ;;  %p2079_p10 = por %p2078_p9, %p2077_p12 }
 0x3bb   : > { %1500 = vst [vmem:[%s363_s19 + $0x50] sm:$0xff] %v1488_v34  ;;  %1501 = vst [vmem:[%s363_s19 + $0x58] sm:$0xff] %v1489_v1 }
 0x3bc   : > { %p2080_p1 = pnand %p2079_p10, %p2073_p6 }
 0x3be   : > { %2083 = shalt.err (!%p2080_p1)
}
 0x3bf   : > { %s2084_s16 = scalar_lea.hbm %s3222_s9, 1536  ;;  %s2088_s8 = scalar_lea.hbm %s3278_s7, 3072 }
 0x3c0   : > { %p2085_p5 = scmp.ne.s32.totalorder %s3222_s9, %s2084_s16  ;;  %p2089_p8 = scmp.lt.u32.totalorder %s3222_s9, %s3278_s7 }
 0x3c1   : > { %p2090_p11 = scmp.lt.u32.totalorder %s2088_s8, %s2084_s16  ;;  %p2092_p2 = scmp.lt.u32.totalorder %s2084_s16, %s3222_s9 }
 0x3c2   : > { %p2086_p13 = pnand %p2085_p5, %p3383_p4 }
 0x3c3   : > { %p2091_p0 = por %p2090_p11, %p2089_p8 }
 0x3c4   : > { %p2087_p3 = pneg %p2086_p13 }
 0x3c5   : > { %p2093_p7 = por %p2092_p2, %p2091_p0 }
 0x3c7   : > { %p2094_p6 = pnand %p2093_p7, %p2087_p3 }
 0x3c9   : > { %2097 = shalt.err (!%p2094_p6)
}
 0x3ca   : > { %1747 = dma.vmem_to_hbm [thread:$0]  (%p3383_p4), %s3224_s22, 1536, %s3222_s9, %s1508_s18, %s2163_s20, %s2163_s20, %s2164_s5  }
 0x3cb PF: > { %s1554_s19 = sand.u32 1, %s2136_s24   ;;  %p3384_p12 = scmp.ne.s32.totalorder %s3329_s14, 0 }
 0x3cc   : > { %p3385_p9 = scmp.ge.s32.totalorder %s2148_s27, 2  ;;  %s1555_s23 = scalar_lea.sflag [#allocation4], %s1554_s19 }
 0x3ce   : > { %p1762_p10 = pnand %p3385_p9, %p3384_p12 }
 0x3d0   : > { %2127 = dma.done.wait (!%p1762_p10), %s1555_s23, 1536  }
 0x3d1   : > { %2129 = vsyncadd (!%p1762_p10), %s1555_s23, 4294965760  ;;  %s1564_s13 = scalar_lea.sflag [#allocation11], %s1554_s19 }
 0x3d2   : > { %2131 = dma.done.wait (!%p1762_p10), %s1564_s13, 1536  }
 0x3d3   : > { %2133 = vsyncadd (!%p1762_p10), %s1564_s13, 4294965760  ;;  %s3386_s26 = sld [smem:[#allocation17_spill]]  ;;  %s3387_s15 = sld [smem:[#allocation18_spill]] }
 0x3d4   : > { %p28_p4 = scmp.ge.s32.totalorder %s2231_s30, 4   ;;  %s3388_s24 = smov %s2140_s25 }
 0x3d5   : > { %s3391_s27 = smov %s2231_s30 }
 0x3d6   :  { %30 = sbr.rel (!%p28_p4) target bundleno = 13 (0xd), region = 124 }
 0x3d9   : > { %s3389_s25 = smov %s3386_s26  ;;  %s3390_s26 = smov %s3387_s15 }
 0x3dd   :  { %1569 = vsyncpa [#allocation3], 1 }
 0x3de   :  { %1571 = vsyncpa [#allocation3 + $0x1], 1 }
 0x3df   :  { %1572 = vsyncpa [#allocation7], 1 }
 0x3e0   :  { %1574 = vsyncpa [#allocation7 + $0x1], 1 }
 0x3e1   :  { %1575 = vsyncpa [#allocation4], 1 }
 0x3e2   :  { %1577 = vsyncpa [#allocation4 + $0x1], 1 }
 0x3e3   :  { %1578 = vsyncpa [#allocation11], 1 }
 0x3e4   :  { %1580 = vsyncpa [#allocation11 + $0x1], 1 }
 0x3e5   :  { %1581 = vsyncpa [#allocation5], 1 }
 0x3e6   :  { %1583 = vsyncpa [#allocation5 + $0x1], 1 }

</bundles_post_ra>
